<compile_context>
chip_gen: v6e
topology: v6e:2x2x1
jax: 0.10.0
libtpu: 0.0.40
codegen_flags: <defaults>
</compile_context>

<pallas_src>
import functools
import math

import jax
import jax.numpy as jnp
from jax import lax
from jax.experimental import pallas as pl
from jax.experimental.pallas import tpu as pltpu

LN_EPS = 1e-5
_INV_SQRT2 = 0.7071067811865476


def _layernorm(x, gamma, beta):
    """LayerNorm over last dim, f32 statistics (matches nn.LayerNorm, eps=1e-5)."""
    mu = jnp.mean(x, axis=-1, keepdims=True)
    var = jnp.mean((x - mu) ** 2, axis=-1, keepdims=True)
    return (x - mu) * lax.rsqrt(var + LN_EPS) * gamma + beta


# ---------------------------------------------------------------------------
# Fused per-layer kernel.  grid = (batch, heads); head axis is sequential.
# All matmuls are plain 2-D MXU dots with bf16 operands and f32 accumulation.
# ---------------------------------------------------------------------------
def layer_kernel(x_ref, g1_ref, be1_ref,
                 wq_ref, wk_ref, wv_ref, wo_ref, bo_ref,
                 g2_ref, be2_ref, w1_ref, fb1_ref, w2_ref, fb2_ref,
                 o_ref, ln1_s, acc_s, *, scale):
    f32 = jnp.float32
    bf16 = jnp.bfloat16
    h = pl.program_id(1)

    # ---- first head step: LayerNorm1 (f32 stats), cache bf16 copy; zero accumulator ----
    @pl.when(h == 0)
    def _():
        x = x_ref[0]                                              # (n, d) f32
        ln1_s[...] = _layernorm(x, g1_ref[0], be1_ref[0]).astype(ln1_s.dtype)
        acc_s[...] = jnp.zeros_like(acc_s)

    # ---- one attention head; accumulate its output-projection contribution ----
    xn = ln1_s[...]                                               # (n, d) bf16
    q = jnp.dot(xn, wq_ref[0], preferred_element_type=f32) * scale   # (n, dh) f32
    k = jnp.dot(xn, wk_ref[0], preferred_element_type=f32)
    v = jnp.dot(xn, wv_ref[0], preferred_element_type=f32)

    s = jnp.dot(q.astype(bf16), k.astype(bf16).T, preferred_element_type=f32)  # (n, n)
    s = s - jnp.max(s, axis=-1, keepdims=True)
    p = jnp.exp(s)                                                # unnormalized probs (f32)
    l = jnp.sum(p, axis=-1, keepdims=True)                        # (n, 1)
    ctx = jnp.dot(p.astype(bf16), v.astype(bf16), preferred_element_type=f32)  # (n, dh)
    ctx = ctx * pl.reciprocal(l, approx=True)                     # normalize AFTER P@V (EUP)
    acc_s[...] += jnp.dot(ctx.astype(bf16), wo_ref[0], preferred_element_type=f32)

    # ---- last head step: attention residual, then PreNorm(FeedForward) + residual ----
    @pl.when(h == pl.num_programs(1) - 1)
    def _():
        x = x_ref[0]
        x_attn = x + acc_s[...] + bo_ref[0]                       # residual 1 (f32)
        xn2 = _layernorm(x_attn, g2_ref[0], be2_ref[0]).astype(bf16)
        h1 = jnp.dot(xn2, w1_ref[...], preferred_element_type=f32) + fb1_ref[0]
        h1 = 0.5 * h1 * (1.0 + lax.erf(h1 * _INV_SQRT2))          # exact GELU, f32
        y2 = jnp.dot(h1.astype(bf16), w2_ref[...], preferred_element_type=f32) + fb2_ref[0]
        o_ref[0] = (x_attn + y2).astype(o_ref.dtype)              # residual 2


def transformer_layer(x, p, heads, *, single_buffer_weights=True):
    b, n, d = x.shape
    assert d % heads == 0
    dh = d // heads
    hdim = p["w1"].shape[1]
    scale = d ** (-0.5)   # NOTE: full-dim scaling, matching previous reference interpretation.

    # Layout plumbing outside the kernel (free): per-head weight tiles.
    wq_h = p["w_q"].reshape(d, heads, dh).transpose(1, 0, 2)      # (heads, d, dh)
    wk_h = p["w_k"].reshape(d, heads, dh).transpose(1, 0, 2)
    wv_h = p["w_v"].reshape(d, heads, dh).transpose(1, 0, 2)
    wo_h = p["w_out"].reshape(heads, dh, d)                       # (heads, dh, d)

    def invariant(shape):
        # Grid-invariant operand: fetched once; single-buffer halves its VMEM residency.
        if single_buffer_weights:
            return pl.BlockSpec(shape, lambda i, j: (0,) * len(shape),
                                pipeline_mode=pl.Buffered(1))
        return pl.BlockSpec(shape, lambda i, j: (0,) * len(shape))

    def per_head(shape):
        return pl.BlockSpec(shape, lambda i, j: (j,) + (0,) * (len(shape) - 1))

    flops = b * (8 * n * d * d + 4 * n * n * d + 4 * n * d * hdim)
    transcendentals = b * (heads * n * n + n * hdim + heads * n + 4 * n)
    bytes_accessed = (2 * b * n * d * 4                      # x in + out (f32)
                      + (4 * d * d + 2 * d * hdim) * 2       # bf16 weights
                      + (6 * d + hdim) * 4)                  # f32 biases / LN params

    return pl.pallas_call(
        functools.partial(layer_kernel, scale=scale),
        out_shape=jax.ShapeDtypeStruct((b, n, d), x.dtype),
        grid=(b, heads),
        in_specs=[
            pl.BlockSpec((1, n, d), lambda i, j: (i, 0, 0)),      # x
            invariant((1, d)),                                    # ln1 gamma
            invariant((1, d)),                                    # ln1 beta
            per_head((1, d, dh)),                                 # w_q (per head)
            per_head((1, d, dh)),                                 # w_k
            per_head((1, d, dh)),                                 # w_v
            per_head((1, dh, d)),                                 # w_out (per head)
            invariant((1, d)),                                    # b_out
            invariant((1, d)),                                    # ln2 gamma
            invariant((1, d)),                                    # ln2 beta
            invariant((d, hdim)),                                 # w1
            invariant((1, hdim)),                                 # b1
            invariant((hdim, d)),                                 # w2
            invariant((1, d)),                                    # b2
        ],
        out_specs=pl.BlockSpec((1, n, d), lambda i, j: (i, 0, 0)),
        scratch_shapes=[
            pltpu.VMEM((n, d), jnp.bfloat16),   # cached LN1(x) as bf16 MXU operand
            pltpu.VMEM((n, d), jnp.float32),    # attention output-projection accumulator
        ],
        compiler_params=pltpu.CompilerParams(
            dimension_semantics=("parallel", "arbitrary"),
            vmem_limit_bytes=32 * 1024 * 1024),
        cost_estimate=pl.CostEstimate(
            flops=int(flops), transcendentals=int(transcendentals),
            bytes_accessed=int(bytes_accessed)),
    )(x, p["ln1_g"], p["ln1_b"], wq_h, wk_h, wv_h, wo_h, p["b_out"],
      p["ln2_g"], p["ln2_b"], p["w1"], p["b1"], p["w2"], p["b2"])


def transformer_forward(x, params, heads, *, single_buffer_weights=True):
    for p in params:
        x = transformer_layer(x, p, heads, single_buffer_weights=single_buffer_weights)
    return x


# ---------------------------------------------------------------------------
# Parameter construction + pure-JAX reference (mirrors kernel math: bf16 MXU
# operands, f32 accumulation, f32 elementwise).
# ---------------------------------------------------------------------------
def init_params(key, dim, depth, heads, mlp_dim):
    params = []
    sd = 1.0 / math.sqrt(dim)
    sh = 1.0 / math.sqrt(mlp_dim)
    for layer in range(depth):
        ks = jax.random.split(jax.random.fold_in(key, layer), 10)
        p = {
            # PreNorm(Attention)
            "ln1_g": jnp.ones((1, dim), jnp.float32)
                     + 0.1 * jax.random.normal(ks[0], (1, dim), jnp.float32),
            "ln1_b": 0.1 * jax.random.normal(ks[1], (1, dim), jnp.float32),
            "w_q": (sd * jax.random.normal(ks[2], (dim, dim), jnp.float32)).astype(jnp.bfloat16),
            "w_k": (sd * jax.random.normal(ks[3], (dim, dim), jnp.float32)).astype(jnp.bfloat16),
            "w_v": (sd * jax.random.normal(ks[4], (dim, dim), jnp.float32)).astype(jnp.bfloat16),
            "w_out": (sd * jax.random.normal(ks[5], (dim, dim), jnp.float32)).astype(jnp.bfloat16),
            "b_out": 0.1 * jax.random.normal(ks[6], (1, dim), jnp.float32),
            # PreNorm(FeedForward)
            "ln2_g": jnp.ones((1, dim), jnp.float32)
                     + 0.1 * jax.random.normal(ks[7], (1, dim), jnp.float32),
            "ln2_b": jnp.zeros((1, dim), jnp.float32),
            "w1": (sd * jax.random.normal(ks[8], (dim, mlp_dim), jnp.float32)).astype(jnp.bfloat16),
            "b1": jnp.zeros((1, mlp_dim), jnp.float32),
            "w2": (sh * jax.random.normal(ks[9], (mlp_dim, dim), jnp.float32)).astype(jnp.bfloat16),
            "b2": jnp.zeros((1, dim), jnp.float32),
        }
        params.append(p)
    return params


def transformer_reference(x, params, heads):
    b, n, d = x.shape
    dh = d // heads
    scale = d ** (-0.5)
    f32, bf16 = jnp.float32, jnp.bfloat16
    for p in params:
        xn = _layernorm(x, p["ln1_g"][0], p["ln1_b"][0]).astype(bf16)
        q = jnp.einsum("bnc,cd->bnd", xn, p["w_q"], preferred_element_type=f32) * scale
        k = jnp.einsum("bnc,cd->bnd", xn, p["w_k"], preferred_element_type=f32)
        v = jnp.einsum("bnc,cd->bnd", xn, p["w_v"], preferred_element_type=f32)
        q = q.reshape(b, n, heads, dh).transpose(0, 2, 1, 3).astype(bf16)
        k = k.reshape(b, n, heads, dh).transpose(0, 2, 1, 3).astype(bf16)
        v = v.reshape(b, n, heads, dh).transpose(0, 2, 1, 3).astype(bf16)
        s = jnp.einsum("bhqd,bhkd->bhqk", q, k, preferred_element_type=f32)
        s = s - jnp.max(s, axis=-1, keepdims=True)
        pr = jnp.exp(s)
        l = jnp.sum(pr, axis=-1, keepdims=True)
        ctx = jnp.einsum("bhqk,bhkd->bhqd", pr.astype(bf16), v, preferred_element_type=f32)
        ctx = (ctx / l).transpose(0, 2, 1, 3).reshape(b, n, d).astype(bf16)
        y = jnp.einsum("bnc,cd->bnd", ctx, p["w_out"], preferred_element_type=f32) + p["b_out"][0]
        x = x + y
        xn2 = _layernorm(x, p["ln2_g"][0], p["ln2_b"][0]).astype(bf16)
        h1 = jnp.einsum("bnc,ch->bnh", xn2, p["w1"], preferred_element_type=f32) + p["b1"][0]
        h1 = 0.5 * h1 * (1.0 + lax.erf(h1 * _INV_SQRT2))
        y2 = jnp.einsum("bnh,hc->bnc", h1.astype(bf16), p["w2"], preferred_element_type=f32) + p["b2"][0]
        x = x + y2
    return x


if __name__ == "__main__":
    # Small shapes consistent with the module: dim=32, depth=2, heads=4, mlp_dim=64
    batch, seq, dim, depth, heads, mlp_dim = 2, 8, 32, 2, 4, 64

    key = jax.random.PRNGKey(0)
    kx, kp = jax.random.split(key)
    x = jax.random.normal(kx, (batch, seq, dim), jnp.float32)
    params = init_params(kp, dim, depth, heads, mlp_dim)

    try:
        out = jax.block_until_ready(
            transformer_forward(x, params, heads, single_buffer_weights=True))
    except Exception:
        # pl.Buffered(1) (single-buffered grid-invariant weights) not supported by this
        # JAX/Pallas version -> fall back to default double buffering.
        out = jax.block_until_ready(
            transformer_forward(x, params, heads, single_buffer_weights=False))

    ref = transformer_reference(x, params, heads)
    assert out.shape == (batch, seq, dim)
    assert bool(jnp.all(jnp.isfinite(out)))
    max_diff = float(jnp.max(jnp.abs(out - ref)))
    assert jnp.allclose(out, ref, rtol=2e-2, atol=2e-2), (
        f"mismatch vs pure-JAX reference: max |diff| = {max_diff}")

    print("KERNEL_OK")
</pallas_src>

<mosaic_0001>
module attributes {stable_mosaic.version = 11 : i64} {
  func.func @layer_kernel(%arg0: i32, %arg1: i32, %arg2: memref<1x8x32xf32, #tpu.memory_space<vmem>>, %arg3: memref<1x32xf32, #tpu.memory_space<vmem>>, %arg4: memref<1x32xf32, #tpu.memory_space<vmem>>, %arg5: memref<1x32x8xbf16, #tpu.memory_space<vmem>>, %arg6: memref<1x32x8xbf16, #tpu.memory_space<vmem>>, %arg7: memref<1x32x8xbf16, #tpu.memory_space<vmem>>, %arg8: memref<1x8x32xbf16, #tpu.memory_space<vmem>>, %arg9: memref<1x32xf32, #tpu.memory_space<vmem>>, %arg10: memref<1x32xf32, #tpu.memory_space<vmem>>, %arg11: memref<1x32xf32, #tpu.memory_space<vmem>>, %arg12: memref<32x64xbf16, #tpu.memory_space<vmem>>, %arg13: memref<1x64xf32, #tpu.memory_space<vmem>>, %arg14: memref<64x32xbf16, #tpu.memory_space<vmem>>, %arg15: memref<1x32xf32, #tpu.memory_space<vmem>>, %arg16: memref<1x8x32xf32, #tpu.memory_space<vmem>>, %arg17: memref<8x32xbf16, #tpu.memory_space<vmem>>, %arg18: memref<8x32xf32, #tpu.memory_space<vmem>>) attributes {dimension_semantics = [#tpu.dimension_semantics<parallel>, #tpu.dimension_semantics<arbitrary>], iteration_bounds = array<i64: 2, 4>, scalar_prefetch = 0 : i64, scratch_operands = 2 : i64, tpu.core_type = #tpu.core_type<tc>, window_params = [{transform_indices = @transform_0, window_bounds = array<i64: 1, 8, 32>}, {pipeline_mode = #tpu.pipeline_mode<synchronous>, transform_indices = @transform_1, window_bounds = array<i64: 1, 32>}, {pipeline_mode = #tpu.pipeline_mode<synchronous>, transform_indices = @transform_2, window_bounds = array<i64: 1, 32>}, {transform_indices = @transform_3, window_bounds = array<i64: 1, 32, 8>}, {transform_indices = @transform_4, window_bounds = array<i64: 1, 32, 8>}, {transform_indices = @transform_5, window_bounds = array<i64: 1, 32, 8>}, {transform_indices = @transform_6, window_bounds = array<i64: 1, 8, 32>}, {pipeline_mode = #tpu.pipeline_mode<synchronous>, transform_indices = @transform_7, window_bounds = array<i64: 1, 32>}, {pipeline_mode = #tpu.pipeline_mode<synchronous>, transform_indices = @transform_8, window_bounds = array<i64: 1, 32>}, {pipeline_mode = #tpu.pipeline_mode<synchronous>, transform_indices = @transform_9, window_bounds = array<i64: 1, 32>}, {pipeline_mode = #tpu.pipeline_mode<synchronous>, transform_indices = @transform_10, window_bounds = array<i64: 32, 64>}, {pipeline_mode = #tpu.pipeline_mode<synchronous>, transform_indices = @transform_11, window_bounds = array<i64: 1, 64>}, {pipeline_mode = #tpu.pipeline_mode<synchronous>, transform_indices = @transform_12, window_bounds = array<i64: 64, 32>}, {pipeline_mode = #tpu.pipeline_mode<synchronous>, transform_indices = @transform_13, window_bounds = array<i64: 1, 32>}, {transform_indices = @transform_14, window_bounds = array<i64: 1, 8, 32>}]} {
    %c0_i32 = arith.constant 0 : i32
    %0 = arith.cmpi eq, %arg1, %c0_i32 : i32
    %1 = arith.extui %0 : i1 to i32
    %c0_i32_0 = arith.constant 0 : i32
    %2 = arith.cmpi ne, %1, %c0_i32_0 : i32
    scf.if %2 {
      %c0_27 = arith.constant 0 : index
      %c0_28 = arith.constant 0 : index
      %c0_29 = arith.constant 0 : index
      %42 = vector.load %arg2[%c0_27, %c0_28, %c0_29] : memref<1x8x32xf32, #tpu.memory_space<vmem>>, vector<1x8x32xf32>
      %43 = vector.shape_cast %42 : vector<1x8x32xf32> to vector<8x32xf32>
      %c0_30 = arith.constant 0 : index
      %c0_31 = arith.constant 0 : index
      %44 = vector.load %arg3[%c0_30, %c0_31] : memref<1x32xf32, #tpu.memory_space<vmem>>, vector<1x32xf32>
      %45 = vector.shape_cast %44 : vector<1x32xf32> to vector<32xf32>
      %c0_32 = arith.constant 0 : index
      %c0_33 = arith.constant 0 : index
      %46 = vector.load %arg4[%c0_32, %c0_33] : memref<1x32xf32, #tpu.memory_space<vmem>>, vector<1x32xf32>
      %47 = vector.shape_cast %46 : vector<1x32xf32> to vector<32xf32>
      %cst_34 = arith.constant dense<0.000000e+00> : vector<8xf32>
      %48 = vector.multi_reduction <add>, %43, %cst_34 [1] : vector<8x32xf32> to vector<8xf32>
      %49 = vector.shape_cast %48 : vector<8xf32> to vector<8x1xf32>
      %cst_35 = arith.constant 3.200000e+01 : f32
      %50 = vector.broadcast %cst_35 : f32 to vector<8x1xf32>
      %51 = arith.divf %49, %50 : vector<8x1xf32>
      %52 = vector.broadcast %51 : vector<8x1xf32> to vector<8x32xf32>
      %53 = arith.subf %43, %52 : vector<8x32xf32>
      %54 = arith.mulf %53, %53 : vector<8x32xf32>
      %cst_36 = arith.constant dense<0.000000e+00> : vector<8xf32>
      %55 = vector.multi_reduction <add>, %54, %cst_36 [1] : vector<8x32xf32> to vector<8xf32>
      %56 = vector.shape_cast %55 : vector<8xf32> to vector<8x1xf32>
      %cst_37 = arith.constant 3.200000e+01 : f32
      %57 = vector.broadcast %cst_37 : f32 to vector<8x1xf32>
      %58 = arith.divf %56, %57 : vector<8x1xf32>
      %59 = vector.broadcast %51 : vector<8x1xf32> to vector<8x32xf32>
      %60 = arith.subf %43, %59 : vector<8x32xf32>
      %cst_38 = arith.constant 9.99999974E-6 : f32
      %61 = vector.broadcast %cst_38 : f32 to vector<8x1xf32>
      %62 = arith.addf %58, %61 : vector<8x1xf32>
      %63 = math.rsqrt %62 : vector<8x1xf32>
      %64 = vector.broadcast %63 : vector<8x1xf32> to vector<8x32xf32>
      %65 = arith.mulf %60, %64 : vector<8x32xf32>
      %66 = vector.shape_cast %45 : vector<32xf32> to vector<1x32xf32>
      %67 = vector.broadcast %66 : vector<1x32xf32> to vector<8x32xf32>
      %68 = arith.mulf %65, %67 : vector<8x32xf32>
      %69 = vector.shape_cast %47 : vector<32xf32> to vector<1x32xf32>
      %70 = vector.broadcast %69 : vector<1x32xf32> to vector<8x32xf32>
      %71 = arith.addf %68, %70 : vector<8x32xf32>
      %72 = arith.truncf %71 : vector<8x32xf32> to vector<8x32xbf16>
      %c0_39 = arith.constant 0 : index
      %c0_40 = arith.constant 0 : index
      %73 = vector.load %arg17[%c0_39, %c0_40] : memref<8x32xbf16, #tpu.memory_space<vmem>>, vector<8x32xbf16>
      tpu.vector_store %arg17[%c0_39, %c0_40], %72 {strides = array<i32>} : memref<8x32xbf16, #tpu.memory_space<vmem>>, vector<8x32xbf16>,
      %cst_41 = arith.constant 0.000000e+00 : f32
      %74 = vector.broadcast %cst_41 : f32 to vector<8x32xf32>
      %c0_42 = arith.constant 0 : index
      %c0_43 = arith.constant 0 : index
      %75 = vector.load %arg18[%c0_42, %c0_43] : memref<8x32xf32, #tpu.memory_space<vmem>>, vector<8x32xf32>
      tpu.vector_store %arg18[%c0_42, %c0_43], %74 {strides = array<i32>} : memref<8x32xf32, #tpu.memory_space<vmem>>, vector<8x32xf32>,
    } else {
    }
    %c0 = arith.constant 0 : index
    %c0_1 = arith.constant 0 : index
    %3 = vector.load %arg17[%c0, %c0_1] : memref<8x32xbf16, #tpu.memory_space<vmem>>, vector<8x32xbf16>
    %c0_2 = arith.constant 0 : index
    %c0_3 = arith.constant 0 : index
    %c0_4 = arith.constant 0 : index
    %4 = vector.load %arg5[%c0_2, %c0_3, %c0_4] : memref<1x32x8xbf16, #tpu.memory_space<vmem>>, vector<1x32x8xbf16>
    %5 = vector.shape_cast %4 : vector<1x32x8xbf16> to vector<32x8xbf16>
    %cst = arith.constant dense<0.000000e+00> : vector<8x8xf32>
    %6 = tpu.matmul %3, %5, %cst {dimension_numbers = #tpu.dot_dimension_numbers<[1], [0], [0], [1], [0, 0, 1, 1], [], []>} : vector<8x32xbf16>, vector<32x8xbf16>, vector<8x8xf32> -> vector<8x8xf32>
    %cst_5 = arith.constant 0.176776692 : f32
    %7 = vector.broadcast %cst_5 : f32 to vector<8x8xf32>
    %8 = arith.mulf %6, %7 : vector<8x8xf32>
    %c0_6 = arith.constant 0 : index
    %c0_7 = arith.constant 0 : index
    %c0_8 = arith.constant 0 : index
    %9 = vector.load %arg6[%c0_6, %c0_7, %c0_8] : memref<1x32x8xbf16, #tpu.memory_space<vmem>>, vector<1x32x8xbf16>
    %10 = vector.shape_cast %9 : vector<1x32x8xbf16> to vector<32x8xbf16>
    %cst_9 = arith.constant dense<0.000000e+00> : vector<8x8xf32>
    %11 = tpu.matmul %3, %10, %cst_9 {dimension_numbers = #tpu.dot_dimension_numbers<[1], [0], [0], [1], [0, 0, 1, 1], [], []>} : vector<8x32xbf16>, vector<32x8xbf16>, vector<8x8xf32> -> vector<8x8xf32>
    %c0_10 = arith.constant 0 : index
    %c0_11 = arith.constant 0 : index
    %c0_12 = arith.constant 0 : index
    %12 = vector.load %arg7[%c0_10, %c0_11, %c0_12] : memref<1x32x8xbf16, #tpu.memory_space<vmem>>, vector<1x32x8xbf16>
    %13 = vector.shape_cast %12 : vector<1x32x8xbf16> to vector<32x8xbf16>
    %cst_13 = arith.constant dense<0.000000e+00> : vector<8x8xf32>
    %14 = tpu.matmul %3, %13, %cst_13 {dimension_numbers = #tpu.dot_dimension_numbers<[1], [0], [0], [1], [0, 0, 1, 1], [], []>} : vector<8x32xbf16>, vector<32x8xbf16>, vector<8x8xf32> -> vector<8x8xf32>
    %15 = arith.truncf %8 : vector<8x8xf32> to vector<8x8xbf16>
    %16 = arith.truncf %11 : vector<8x8xf32> to vector<8x8xbf16>
    %17 = tpu.transpose %16, [1, 0] : vector<8x8xbf16> -> vector<8x8xbf16>
    %cst_14 = arith.constant dense<0.000000e+00> : vector<8x8xf32>
    %18 = tpu.matmul %15, %17, %cst_14 {dimension_numbers = #tpu.dot_dimension_numbers<[1], [0], [0], [1], [0, 0, 1, 1], [], []>} : vector<8x8xbf16>, vector<8x8xbf16>, vector<8x8xf32> -> vector<8x8xf32>
    %cst_15 = arith.constant dense<0xFF800000> : vector<8xf32>
    %19 = vector.multi_reduction <maximumf>, %18, %cst_15 [1] : vector<8x8xf32> to vector<8xf32>
    %20 = vector.shape_cast %19 : vector<8xf32> to vector<8x1xf32>
    %21 = vector.broadcast %20 : vector<8x1xf32> to vector<8x8xf32>
    %22 = arith.subf %18, %21 : vector<8x8xf32>
    %23 = math.exp %22 : vector<8x8xf32>
    %cst_16 = arith.constant dense<0.000000e+00> : vector<8xf32>
    %24 = vector.multi_reduction <add>, %23, %cst_16 [1] : vector<8x8xf32> to vector<8xf32>
    %25 = vector.shape_cast %24 : vector<8xf32> to vector<8x1xf32>
    %26 = arith.truncf %23 : vector<8x8xf32> to vector<8x8xbf16>
    %27 = arith.truncf %14 : vector<8x8xf32> to vector<8x8xbf16>
    %cst_17 = arith.constant dense<0.000000e+00> : vector<8x8xf32>
    %28 = tpu.matmul %26, %27, %cst_17 {dimension_numbers = #tpu.dot_dimension_numbers<[1], [0], [0], [1], [0, 0, 1, 1], [], []>} : vector<8x8xbf16>, vector<8x8xbf16>, vector<8x8xf32> -> vector<8x8xf32>
    %29 = tpu.reciprocal %25 {approx = true} : vector<8x1xf32> -> vector<8x1xf32>
    %30 = vector.broadcast %29 : vector<8x1xf32> to vector<8x8xf32>
    %31 = arith.mulf %28, %30 : vector<8x8xf32>
    %c0_18 = arith.constant 0 : index
    %c0_19 = arith.constant 0 : index
    %32 = vector.load %arg18[%c0_18, %c0_19] : memref<8x32xf32, #tpu.memory_space<vmem>>, vector<8x32xf32>
    %33 = arith.truncf %31 : vector<8x8xf32> to vector<8x8xbf16>
    %c0_20 = arith.constant 0 : index
    %c0_21 = arith.constant 0 : index
    %c0_22 = arith.constant 0 : index
    %34 = vector.load %arg8[%c0_20, %c0_21, %c0_22] : memref<1x8x32xbf16, #tpu.memory_space<vmem>>, vector<1x8x32xbf16>
    %35 = vector.shape_cast %34 : vector<1x8x32xbf16> to vector<8x32xbf16>
    %cst_23 = arith.constant dense<0.000000e+00> : vector<8x32xf32>
    %36 = tpu.matmul %33, %35, %cst_23 {dimension_numbers = #tpu.dot_dimension_numbers<[1], [0], [0], [1], [0, 0, 1, 1], [], []>} : vector<8x8xbf16>, vector<8x32xbf16>, vector<8x32xf32> -> vector<8x32xf32>
    %37 = arith.addf %32, %36 : vector<8x32xf32>
    %c0_24 = arith.constant 0 : index
    %c0_25 = arith.constant 0 : index
    %38 = vector.load %arg18[%c0_24, %c0_25] : memref<8x32xf32, #tpu.memory_space<vmem>>, vector<8x32xf32>
    tpu.vector_store %arg18[%c0_24, %c0_25], %37 {strides = array<i32>} : memref<8x32xf32, #tpu.memory_space<vmem>>, vector<8x32xf32>,
    %c3_i32 = arith.constant 3 : i32
    %39 = arith.cmpi eq, %arg1, %c3_i32 : i32
    %40 = arith.extui %39 : i1 to i32
    %c0_i32_26 = arith.constant 0 : i32
    %41 = arith.cmpi ne, %40, %c0_i32_26 : i32
    scf.if %41 {
      %c0_27 = arith.constant 0 : index
      %c0_28 = arith.constant 0 : index
      %c0_29 = arith.constant 0 : index
      %42 = vector.load %arg2[%c0_27, %c0_28, %c0_29] : memref<1x8x32xf32, #tpu.memory_space<vmem>>, vector<1x8x32xf32>
      %43 = vector.shape_cast %42 : vector<1x8x32xf32> to vector<8x32xf32>
      %c0_30 = arith.constant 0 : index
      %c0_31 = arith.constant 0 : index
      %44 = vector.load %arg18[%c0_30, %c0_31] : memref<8x32xf32, #tpu.memory_space<vmem>>, vector<8x32xf32>
      %45 = arith.addf %43, %44 : vector<8x32xf32>
      %c0_32 = arith.constant 0 : index
      %c0_33 = arith.constant 0 : index
      %46 = vector.load %arg9[%c0_32, %c0_33] : memref<1x32xf32, #tpu.memory_space<vmem>>, vector<1x32xf32>
      %47 = vector.shape_cast %46 : vector<1x32xf32> to vector<32xf32>
      %48 = vector.shape_cast %47 : vector<32xf32> to vector<1x32xf32>
      %49 = vector.broadcast %48 : vector<1x32xf32> to vector<8x32xf32>
      %50 = arith.addf %45, %49 : vector<8x32xf32>
      %c0_34 = arith.constant 0 : index
      %c0_35 = arith.constant 0 : index
      %51 = vector.load %arg10[%c0_34, %c0_35] : memref<1x32xf32, #tpu.memory_space<vmem>>, vector<1x32xf32>
      %52 = vector.shape_cast %51 : vector<1x32xf32> to vector<32xf32>
      %c0_36 = arith.constant 0 : index
      %c0_37 = arith.constant 0 : index
      %53 = vector.load %arg11[%c0_36, %c0_37] : memref<1x32xf32, #tpu.memory_space<vmem>>, vector<1x32xf32>
      %54 = vector.shape_cast %53 : vector<1x32xf32> to vector<32xf32>
      %cst_38 = arith.constant dense<0.000000e+00> : vector<8xf32>
      %55 = vector.multi_reduction <add>, %50, %cst_38 [1] : vector<8x32xf32> to vector<8xf32>
      %56 = vector.shape_cast %55 : vector<8xf32> to vector<8x1xf32>
      %cst_39 = arith.constant 3.200000e+01 : f32
      %57 = vector.broadcast %cst_39 : f32 to vector<8x1xf32>
      %58 = arith.divf %56, %57 : vector<8x1xf32>
      %59 = vector.broadcast %58 : vector<8x1xf32> to vector<8x32xf32>
      %60 = arith.subf %50, %59 : vector<8x32xf32>
      %61 = arith.mulf %60, %60 : vector<8x32xf32>
      %cst_40 = arith.constant dense<0.000000e+00> : vector<8xf32>
      %62 = vector.multi_reduction <add>, %61, %cst_40 [1] : vector<8x32xf32> to vector<8xf32>
      %63 = vector.shape_cast %62 : vector<8xf32> to vector<8x1xf32>
      %cst_41 = arith.constant 3.200000e+01 : f32
      %64 = vector.broadcast %cst_41 : f32 to vector<8x1xf32>
      %65 = arith.divf %63, %64 : vector<8x1xf32>
      %66 = vector.broadcast %58 : vector<8x1xf32> to vector<8x32xf32>
      %67 = arith.subf %50, %66 : vector<8x32xf32>
      %cst_42 = arith.constant 9.99999974E-6 : f32
      %68 = vector.broadcast %cst_42 : f32 to vector<8x1xf32>
      %69 = arith.addf %65, %68 : vector<8x1xf32>
      %70 = math.rsqrt %69 : vector<8x1xf32>
      %71 = vector.broadcast %70 : vector<8x1xf32> to vector<8x32xf32>
      %72 = arith.mulf %67, %71 : vector<8x32xf32>
      %73 = vector.shape_cast %52 : vector<32xf32> to vector<1x32xf32>
      %74 = vector.broadcast %73 : vector<1x32xf32> to vector<8x32xf32>
      %75 = arith.mulf %72, %74 : vector<8x32xf32>
      %76 = vector.shape_cast %54 : vector<32xf32> to vector<1x32xf32>
      %77 = vector.broadcast %76 : vector<1x32xf32> to vector<8x32xf32>
      %78 = arith.addf %75, %77 : vector<8x32xf32>
      %79 = arith.truncf %78 : vector<8x32xf32> to vector<8x32xbf16>
      %c0_43 = arith.constant 0 : index
      %c0_44 = arith.constant 0 : index
      %80 = vector.load %arg12[%c0_43, %c0_44] : memref<32x64xbf16, #tpu.memory_space<vmem>>, vector<32x64xbf16>
      %cst_45 = arith.constant dense<0.000000e+00> : vector<8x64xf32>
      %81 = tpu.matmul %79, %80, %cst_45 {dimension_numbers = #tpu.dot_dimension_numbers<[1], [0], [0], [1], [0, 0, 1, 1], [], []>} : vector<8x32xbf16>, vector<32x64xbf16>, vector<8x64xf32> -> vector<8x64xf32>
      %c0_46 = arith.constant 0 : index
      %c0_47 = arith.constant 0 : index
      %82 = vector.load %arg13[%c0_46, %c0_47] : memref<1x64xf32, #tpu.memory_space<vmem>>, vector<1x64xf32>
      %83 = vector.shape_cast %82 : vector<1x64xf32> to vector<64xf32>
      %84 = vector.shape_cast %83 : vector<64xf32> to vector<1x64xf32>
      %85 = vector.broadcast %84 : vector<1x64xf32> to vector<8x64xf32>
      %86 = arith.addf %81, %85 : vector<8x64xf32>
      %cst_48 = arith.constant 5.000000e-01 : f32
      %87 = vector.broadcast %cst_48 : f32 to vector<8x64xf32>
      %88 = arith.mulf %87, %86 : vector<8x64xf32>
      %cst_49 = arith.constant 0.707106769 : f32
      %89 = vector.broadcast %cst_49 : f32 to vector<8x64xf32>
      %90 = arith.mulf %86, %89 : vector<8x64xf32>
      %91 = math.erf %90 : vector<8x64xf32>
      %cst_50 = arith.constant 1.000000e+00 : f32
      %92 = vector.broadcast %cst_50 : f32 to vector<8x64xf32>
      %93 = arith.addf %92, %91 : vector<8x64xf32>
      %94 = arith.mulf %88, %93 : vector<8x64xf32>
      %95 = arith.truncf %94 : vector<8x64xf32> to vector<8x64xbf16>
      %c0_51 = arith.constant 0 : index
      %c0_52 = arith.constant 0 : index
      %96 = vector.load %arg14[%c0_51, %c0_52] : memref<64x32xbf16, #tpu.memory_space<vmem>>, vector<64x32xbf16>
      %cst_53 = arith.constant dense<0.000000e+00> : vector<8x32xf32>
      %97 = tpu.matmul %95, %96, %cst_53 {dimension_numbers = #tpu.dot_dimension_numbers<[1], [0], [0], [1], [0, 0, 1, 1], [], []>} : vector<8x64xbf16>, vector<64x32xbf16>, vector<8x32xf32> -> vector<8x32xf32>
      %c0_54 = arith.constant 0 : index
      %c0_55 = arith.constant 0 : index
      %98 = vector.load %arg15[%c0_54, %c0_55] : memref<1x32xf32, #tpu.memory_space<vmem>>, vector<1x32xf32>
      %99 = vector.shape_cast %98 : vector<1x32xf32> to vector<32xf32>
      %100 = vector.shape_cast %99 : vector<32xf32> to vector<1x32xf32>
      %101 = vector.broadcast %100 : vector<1x32xf32> to vector<8x32xf32>
      %102 = arith.addf %97, %101 : vector<8x32xf32>
      %103 = arith.addf %50, %102 : vector<8x32xf32>
      %c0_56 = arith.constant 0 : index
      %c0_57 = arith.constant 0 : index
      %c0_58 = arith.constant 0 : index
      %104 = vector.load %arg16[%c0_56, %c0_57, %c0_58] : memref<1x8x32xf32, #tpu.memory_space<vmem>>, vector<1x8x32xf32>
      %105 = vector.shape_cast %104 : vector<1x8x32xf32> to vector<8x32xf32>
      %106 = vector.shape_cast %103 : vector<8x32xf32> to vector<1x8x32xf32>
      tpu.vector_store %arg16[%c0_56, %c0_57, %c0_58], %106 {strides = array<i32>} : memref<1x8x32xf32, #tpu.memory_space<vmem>>, vector<1x8x32xf32>,
    } else {
    }
    return
  }
  func.func @transform_0(%arg0: i32, %arg1: i32) -> (i32, i32, i32) {
    %c0_i32 = arith.constant 0 : i32
    %c0_i32_0 = arith.constant 0 : i32
    %c0_i32_1 = arith.constant 0 : i32
    return %arg0, %c0_i32, %c0_i32_0 : i32, i32, i32
  }
  func.func @transform_1(%arg0: i32, %arg1: i32) -> (i32, i32) {
    %c0_i32 = arith.constant 0 : i32
    %c0_i32_0 = arith.constant 0 : i32
    %c0_i32_1 = arith.constant 0 : i32
    return %c0_i32, %c0_i32_0 : i32, i32
  }
  func.func @transform_2(%arg0: i32, %arg1: i32) -> (i32, i32) {
    %c0_i32 = arith.constant 0 : i32
    %c0_i32_0 = arith.constant 0 : i32
    %c0_i32_1 = arith.constant 0 : i32
    return %c0_i32, %c0_i32_0 : i32, i32
  }
  func.func @transform_3(%arg0: i32, %arg1: i32) -> (i32, i32, i32) {
    %c0_i32 = arith.constant 0 : i32
    %c0_i32_0 = arith.constant 0 : i32
    %c0_i32_1 = arith.constant 0 : i32
    return %arg1, %c0_i32, %c0_i32_0 : i32, i32, i32
  }
  func.func @transform_4(%arg0: i32, %arg1: i32) -> (i32, i32, i32) {
    %c0_i32 = arith.constant 0 : i32
    %c0_i32_0 = arith.constant 0 : i32
    %c0_i32_1 = arith.constant 0 : i32
    return %arg1, %c0_i32, %c0_i32_0 : i32, i32, i32
  }
  func.func @transform_5(%arg0: i32, %arg1: i32) -> (i32, i32, i32) {
    %c0_i32 = arith.constant 0 : i32
    %c0_i32_0 = arith.constant 0 : i32
    %c0_i32_1 = arith.constant 0 : i32
    return %arg1, %c0_i32, %c0_i32_0 : i32, i32, i32
  }
  func.func @transform_6(%arg0: i32, %arg1: i32) -> (i32, i32, i32) {
    %c0_i32 = arith.constant 0 : i32
    %c0_i32_0 = arith.constant 0 : i32
    %c0_i32_1 = arith.constant 0 : i32
    return %arg1, %c0_i32, %c0_i32_0 : i32, i32, i32
  }
  func.func @transform_7(%arg0: i32, %arg1: i32) -> (i32, i32) {
    %c0_i32 = arith.constant 0 : i32
    %c0_i32_0 = arith.constant 0 : i32
    %c0_i32_1 = arith.constant 0 : i32
    return %c0_i32, %c0_i32_0 : i32, i32
  }
  func.func @transform_8(%arg0: i32, %arg1: i32) -> (i32, i32) {
    %c0_i32 = arith.constant 0 : i32
    %c0_i32_0 = arith.constant 0 : i32
    %c0_i32_1 = arith.constant 0 : i32
    return %c0_i32, %c0_i32_0 : i32, i32
  }
  func.func @transform_9(%arg0: i32, %arg1: i32) -> (i32, i32) {
    %c0_i32 = arith.constant 0 : i32
    %c0_i32_0 = arith.constant 0 : i32
    %c0_i32_1 = arith.constant 0 : i32
    return %c0_i32, %c0_i32_0 : i32, i32
  }
  func.func @transform_10(%arg0: i32, %arg1: i32) -> (i32, i32) {
    %c0_i32 = arith.constant 0 : i32
    %c0_i32_0 = arith.constant 0 : i32
    %c0_i32_1 = arith.constant 0 : i32
    return %c0_i32, %c0_i32_0 : i32, i32
  }
  func.func @transform_11(%arg0: i32, %arg1: i32) -> (i32, i32) {
    %c0_i32 = arith.constant 0 : i32
    %c0_i32_0 = arith.constant 0 : i32
    %c0_i32_1 = arith.constant 0 : i32
    return %c0_i32, %c0_i32_0 : i32, i32
  }
  func.func @transform_12(%arg0: i32, %arg1: i32) -> (i32, i32) {
    %c0_i32 = arith.constant 0 : i32
    %c0_i32_0 = arith.constant 0 : i32
    %c0_i32_1 = arith.constant 0 : i32
    return %c0_i32, %c0_i32_0 : i32, i32
  }
  func.func @transform_13(%arg0: i32, %arg1: i32) -> (i32, i32) {
    %c0_i32 = arith.constant 0 : i32
    %c0_i32_0 = arith.constant 0 : i32
    %c0_i32_1 = arith.constant 0 : i32
    return %c0_i32, %c0_i32_0 : i32, i32
  }
  func.func @transform_14(%arg0: i32, %arg1: i32) -> (i32, i32, i32) {
    %c0_i32 = arith.constant 0 : i32
    %c0_i32_0 = arith.constant 0 : i32
    %c0_i32_1 = arith.constant 0 : i32
    return %arg0, %c0_i32, %c0_i32_0 : i32, i32, i32
  }
}

module attributes {stable_mosaic.version = 11 : i64} {
  func.func @layer_kernel(%arg0: i32, %arg1: i32, %arg2: memref<1x8x32xf32, #tpu.memory_space<vmem>>, %arg3: memref<1x32xf32, #tpu.memory_space<vmem>>, %arg4: memref<1x32xf32, #tpu.memory_space<vmem>>, %arg5: memref<1x32x8xbf16, #tpu.memory_space<vmem>>, %arg6: memref<1x32x8xbf16, #tpu.memory_space<vmem>>, %arg7: memref<1x32x8xbf16, #tpu.memory_space<vmem>>, %arg8: memref<1x8x32xbf16, #tpu.memory_space<vmem>>, %arg9: memref<1x32xf32, #tpu.memory_space<vmem>>, %arg10: memref<1x32xf32, #tpu.memory_space<vmem>>, %arg11: memref<1x32xf32, #tpu.memory_space<vmem>>, %arg12: memref<32x64xbf16, #tpu.memory_space<vmem>>, %arg13: memref<1x64xf32, #tpu.memory_space<vmem>>, %arg14: memref<64x32xbf16, #tpu.memory_space<vmem>>, %arg15: memref<1x32xf32, #tpu.memory_space<vmem>>, %arg16: memref<1x8x32xf32, #tpu.memory_space<vmem>>, %arg17: memref<8x32xbf16, #tpu.memory_space<vmem>>, %arg18: memref<8x32xf32, #tpu.memory_space<vmem>>) attributes {dimension_semantics = [#tpu.dimension_semantics<parallel>, #tpu.dimension_semantics<arbitrary>], iteration_bounds = array<i64: 2, 4>, scalar_prefetch = 0 : i64, scratch_operands = 2 : i64, tpu.core_type = #tpu.core_type<tc>, window_params = [{transform_indices = @transform_0, window_bounds = array<i64: 1, 8, 32>}, {pipeline_mode = #tpu.pipeline_mode<synchronous>, transform_indices = @transform_1, window_bounds = array<i64: 1, 32>}, {pipeline_mode = #tpu.pipeline_mode<synchronous>, transform_indices = @transform_2, window_bounds = array<i64: 1, 32>}, {transform_indices = @transform_3, window_bounds = array<i64: 1, 32, 8>}, {transform_indices = @transform_4, window_bounds = array<i64: 1, 32, 8>}, {transform_indices = @transform_5, window_bounds = array<i64: 1, 32, 8>}, {transform_indices = @transform_6, window_bounds = array<i64: 1, 8, 32>}, {pipeline_mode = #tpu.pipeline_mode<synchronous>, transform_indices = @transform_7, window_bounds = array<i64: 1, 32>}, {pipeline_mode = #tpu.pipeline_mode<synchronous>, transform_indices = @transform_8, window_bounds = array<i64: 1, 32>}, {pipeline_mode = #tpu.pipeline_mode<synchronous>, transform_indices = @transform_9, window_bounds = array<i64: 1, 32>}, {pipeline_mode = #tpu.pipeline_mode<synchronous>, transform_indices = @transform_10, window_bounds = array<i64: 32, 64>}, {pipeline_mode = #tpu.pipeline_mode<synchronous>, transform_indices = @transform_11, window_bounds = array<i64: 1, 64>}, {pipeline_mode = #tpu.pipeline_mode<synchronous>, transform_indices = @transform_12, window_bounds = array<i64: 64, 32>}, {pipeline_mode = #tpu.pipeline_mode<synchronous>, transform_indices = @transform_13, window_bounds = array<i64: 1, 32>}, {transform_indices = @transform_14, window_bounds = array<i64: 1, 8, 32>}]} {
    %c0_i32 = arith.constant 0 : i32
    %0 = arith.cmpi eq, %arg1, %c0_i32 : i32
    %1 = arith.extui %0 : i1 to i32
    %c0_i32_0 = arith.constant 0 : i32
    %2 = arith.cmpi ne, %1, %c0_i32_0 : i32
    scf.if %2 {
      %c0_27 = arith.constant 0 : index
      %c0_28 = arith.constant 0 : index
      %c0_29 = arith.constant 0 : index
      %42 = vector.load %arg2[%c0_27, %c0_28, %c0_29] : memref<1x8x32xf32, #tpu.memory_space<vmem>>, vector<1x8x32xf32>
      %43 = vector.shape_cast %42 : vector<1x8x32xf32> to vector<8x32xf32>
      %c0_30 = arith.constant 0 : index
      %c0_31 = arith.constant 0 : index
      %44 = vector.load %arg3[%c0_30, %c0_31] : memref<1x32xf32, #tpu.memory_space<vmem>>, vector<1x32xf32>
      %45 = vector.shape_cast %44 : vector<1x32xf32> to vector<32xf32>
      %c0_32 = arith.constant 0 : index
      %c0_33 = arith.constant 0 : index
      %46 = vector.load %arg4[%c0_32, %c0_33] : memref<1x32xf32, #tpu.memory_space<vmem>>, vector<1x32xf32>
      %47 = vector.shape_cast %46 : vector<1x32xf32> to vector<32xf32>
      %cst_34 = arith.constant dense<0.000000e+00> : vector<8xf32>
      %48 = vector.multi_reduction <add>, %43, %cst_34 [1] : vector<8x32xf32> to vector<8xf32>
      %49 = vector.shape_cast %48 : vector<8xf32> to vector<8x1xf32>
      %cst_35 = arith.constant 3.200000e+01 : f32
      %50 = vector.broadcast %cst_35 : f32 to vector<8x1xf32>
      %51 = arith.divf %49, %50 : vector<8x1xf32>
      %52 = vector.broadcast %51 : vector<8x1xf32> to vector<8x32xf32>
      %53 = arith.subf %43, %52 : vector<8x32xf32>
      %54 = arith.mulf %53, %53 : vector<8x32xf32>
      %cst_36 = arith.constant dense<0.000000e+00> : vector<8xf32>
      %55 = vector.multi_reduction <add>, %54, %cst_36 [1] : vector<8x32xf32> to vector<8xf32>
      %56 = vector.shape_cast %55 : vector<8xf32> to vector<8x1xf32>
      %cst_37 = arith.constant 3.200000e+01 : f32
      %57 = vector.broadcast %cst_37 : f32 to vector<8x1xf32>
      %58 = arith.divf %56, %57 : vector<8x1xf32>
      %59 = vector.broadcast %51 : vector<8x1xf32> to vector<8x32xf32>
      %60 = arith.subf %43, %59 : vector<8x32xf32>
      %cst_38 = arith.constant 9.99999974E-6 : f32
      %61 = vector.broadcast %cst_38 : f32 to vector<8x1xf32>
      %62 = arith.addf %58, %61 : vector<8x1xf32>
      %63 = math.rsqrt %62 : vector<8x1xf32>
      %64 = vector.broadcast %63 : vector<8x1xf32> to vector<8x32xf32>
      %65 = arith.mulf %60, %64 : vector<8x32xf32>
      %66 = vector.shape_cast %45 : vector<32xf32> to vector<1x32xf32>
      %67 = vector.broadcast %66 : vector<1x32xf32> to vector<8x32xf32>
      %68 = arith.mulf %65, %67 : vector<8x32xf32>
      %69 = vector.shape_cast %47 : vector<32xf32> to vector<1x32xf32>
      %70 = vector.broadcast %69 : vector<1x32xf32> to vector<8x32xf32>
      %71 = arith.addf %68, %70 : vector<8x32xf32>
      %72 = arith.truncf %71 : vector<8x32xf32> to vector<8x32xbf16>
      %c0_39 = arith.constant 0 : index
      %c0_40 = arith.constant 0 : index
      %73 = vector.load %arg17[%c0_39, %c0_40] : memref<8x32xbf16, #tpu.memory_space<vmem>>, vector<8x32xbf16>
      tpu.vector_store %arg17[%c0_39, %c0_40], %72 {strides = array<i32>} : memref<8x32xbf16, #tpu.memory_space<vmem>>, vector<8x32xbf16>,
      %cst_41 = arith.constant 0.000000e+00 : f32
      %74 = vector.broadcast %cst_41 : f32 to vector<8x32xf32>
      %c0_42 = arith.constant 0 : index
      %c0_43 = arith.constant 0 : index
      %75 = vector.load %arg18[%c0_42, %c0_43] : memref<8x32xf32, #tpu.memory_space<vmem>>, vector<8x32xf32>
      tpu.vector_store %arg18[%c0_42, %c0_43], %74 {strides = array<i32>} : memref<8x32xf32, #tpu.memory_space<vmem>>, vector<8x32xf32>,
    } else {
    }
    %c0 = arith.constant 0 : index
    %c0_1 = arith.constant 0 : index
    %3 = vector.load %arg17[%c0, %c0_1] : memref<8x32xbf16, #tpu.memory_space<vmem>>, vector<8x32xbf16>
    %c0_2 = arith.constant 0 : index
    %c0_3 = arith.constant 0 : index
    %c0_4 = arith.constant 0 : index
    %4 = vector.load %arg5[%c0_2, %c0_3, %c0_4] : memref<1x32x8xbf16, #tpu.memory_space<vmem>>, vector<1x32x8xbf16>
    %5 = vector.shape_cast %4 : vector<1x32x8xbf16> to vector<32x8xbf16>
    %cst = arith.constant dense<0.000000e+00> : vector<8x8xf32>
    %6 = tpu.matmul %3, %5, %cst {dimension_numbers = #tpu.dot_dimension_numbers<[1], [0], [0], [1], [0, 0, 1, 1], [], []>} : vector<8x32xbf16>, vector<32x8xbf16>, vector<8x8xf32> -> vector<8x8xf32>
    %cst_5 = arith.constant 0.176776692 : f32
    %7 = vector.broadcast %cst_5 : f32 to vector<8x8xf32>
    %8 = arith.mulf %6, %7 : vector<8x8xf32>
    %c0_6 = arith.constant 0 : index
    %c0_7 = arith.constant 0 : index
    %c0_8 = arith.constant 0 : index
    %9 = vector.load %arg6[%c0_6, %c0_7, %c0_8] : memref<1x32x8xbf16, #tpu.memory_space<vmem>>, vector<1x32x8xbf16>
    %10 = vector.shape_cast %9 : vector<1x32x8xbf16> to vector<32x8xbf16>
    %cst_9 = arith.constant dense<0.000000e+00> : vector<8x8xf32>
    %11 = tpu.matmul %3, %10, %cst_9 {dimension_numbers = #tpu.dot_dimension_numbers<[1], [0], [0], [1], [0, 0, 1, 1], [], []>} : vector<8x32xbf16>, vector<32x8xbf16>, vector<8x8xf32> -> vector<8x8xf32>
    %c0_10 = arith.constant 0 : index
    %c0_11 = arith.constant 0 : index
    %c0_12 = arith.constant 0 : index
    %12 = vector.load %arg7[%c0_10, %c0_11, %c0_12] : memref<1x32x8xbf16, #tpu.memory_space<vmem>>, vector<1x32x8xbf16>
    %13 = vector.shape_cast %12 : vector<1x32x8xbf16> to vector<32x8xbf16>
    %cst_13 = arith.constant dense<0.000000e+00> : vector<8x8xf32>
    %14 = tpu.matmul %3, %13, %cst_13 {dimension_numbers = #tpu.dot_dimension_numbers<[1], [0], [0], [1], [0, 0, 1, 1], [], []>} : vector<8x32xbf16>, vector<32x8xbf16>, vector<8x8xf32> -> vector<8x8xf32>
    %15 = arith.truncf %8 : vector<8x8xf32> to vector<8x8xbf16>
    %16 = arith.truncf %11 : vector<8x8xf32> to vector<8x8xbf16>
    %17 = tpu.transpose %16, [1, 0] : vector<8x8xbf16> -> vector<8x8xbf16>
    %cst_14 = arith.constant dense<0.000000e+00> : vector<8x8xf32>
    %18 = tpu.matmul %15, %17, %cst_14 {dimension_numbers = #tpu.dot_dimension_numbers<[1], [0], [0], [1], [0, 0, 1, 1], [], []>} : vector<8x8xbf16>, vector<8x8xbf16>, vector<8x8xf32> -> vector<8x8xf32>
    %cst_15 = arith.constant dense<0xFF800000> : vector<8xf32>
    %19 = vector.multi_reduction <maximumf>, %18, %cst_15 [1] : vector<8x8xf32> to vector<8xf32>
    %20 = vector.shape_cast %19 : vector<8xf32> to vector<8x1xf32>
    %21 = vector.broadcast %20 : vector<8x1xf32> to vector<8x8xf32>
    %22 = arith.subf %18, %21 : vector<8x8xf32>
    %23 = math.exp %22 : vector<8x8xf32>
    %cst_16 = arith.constant dense<0.000000e+00> : vector<8xf32>
    %24 = vector.multi_reduction <add>, %23, %cst_16 [1] : vector<8x8xf32> to vector<8xf32>
    %25 = vector.shape_cast %24 : vector<8xf32> to vector<8x1xf32>
    %26 = arith.truncf %23 : vector<8x8xf32> to vector<8x8xbf16>
    %27 = arith.truncf %14 : vector<8x8xf32> to vector<8x8xbf16>
    %cst_17 = arith.constant dense<0.000000e+00> : vector<8x8xf32>
    %28 = tpu.matmul %26, %27, %cst_17 {dimension_numbers = #tpu.dot_dimension_numbers<[1], [0], [0], [1], [0, 0, 1, 1], [], []>} : vector<8x8xbf16>, vector<8x8xbf16>, vector<8x8xf32> -> vector<8x8xf32>
    %29 = tpu.reciprocal %25 {approx = true} : vector<8x1xf32> -> vector<8x1xf32>
    %30 = vector.broadcast %29 : vector<8x1xf32> to vector<8x8xf32>
    %31 = arith.mulf %28, %30 : vector<8x8xf32>
    %c0_18 = arith.constant 0 : index
    %c0_19 = arith.constant 0 : index
    %32 = vector.load %arg18[%c0_18, %c0_19] : memref<8x32xf32, #tpu.memory_space<vmem>>, vector<8x32xf32>
    %33 = arith.truncf %31 : vector<8x8xf32> to vector<8x8xbf16>
    %c0_20 = arith.constant 0 : index
    %c0_21 = arith.constant 0 : index
    %c0_22 = arith.constant 0 : index
    %34 = vector.load %arg8[%c0_20, %c0_21, %c0_22] : memref<1x8x32xbf16, #tpu.memory_space<vmem>>, vector<1x8x32xbf16>
    %35 = vector.shape_cast %34 : vector<1x8x32xbf16> to vector<8x32xbf16>
    %cst_23 = arith.constant dense<0.000000e+00> : vector<8x32xf32>
    %36 = tpu.matmul %33, %35, %cst_23 {dimension_numbers = #tpu.dot_dimension_numbers<[1], [0], [0], [1], [0, 0, 1, 1], [], []>} : vector<8x8xbf16>, vector<8x32xbf16>, vector<8x32xf32> -> vector<8x32xf32>
    %37 = arith.addf %32, %36 : vector<8x32xf32>
    %c0_24 = arith.constant 0 : index
    %c0_25 = arith.constant 0 : index
    %38 = vector.load %arg18[%c0_24, %c0_25] : memref<8x32xf32, #tpu.memory_space<vmem>>, vector<8x32xf32>
    tpu.vector_store %arg18[%c0_24, %c0_25], %37 {strides = array<i32>} : memref<8x32xf32, #tpu.memory_space<vmem>>, vector<8x32xf32>,
    %c3_i32 = arith.constant 3 : i32
    %39 = arith.cmpi eq, %arg1, %c3_i32 : i32
    %40 = arith.extui %39 : i1 to i32
    %c0_i32_26 = arith.constant 0 : i32
    %41 = arith.cmpi ne, %40, %c0_i32_26 : i32
    scf.if %41 {
      %c0_27 = arith.constant 0 : index
      %c0_28 = arith.constant 0 : index
      %c0_29 = arith.constant 0 : index
      %42 = vector.load %arg2[%c0_27, %c0_28, %c0_29] : memref<1x8x32xf32, #tpu.memory_space<vmem>>, vector<1x8x32xf32>
      %43 = vector.shape_cast %42 : vector<1x8x32xf32> to vector<8x32xf32>
      %c0_30 = arith.constant 0 : index
      %c0_31 = arith.constant 0 : index
      %44 = vector.load %arg18[%c0_30, %c0_31] : memref<8x32xf32, #tpu.memory_space<vmem>>, vector<8x32xf32>
      %45 = arith.addf %43, %44 : vector<8x32xf32>
      %c0_32 = arith.constant 0 : index
      %c0_33 = arith.constant 0 : index
      %46 = vector.load %arg9[%c0_32, %c0_33] : memref<1x32xf32, #tpu.memory_space<vmem>>, vector<1x32xf32>
      %47 = vector.shape_cast %46 : vector<1x32xf32> to vector<32xf32>
      %48 = vector.shape_cast %47 : vector<32xf32> to vector<1x32xf32>
      %49 = vector.broadcast %48 : vector<1x32xf32> to vector<8x32xf32>
      %50 = arith.addf %45, %49 : vector<8x32xf32>
      %c0_34 = arith.constant 0 : index
      %c0_35 = arith.constant 0 : index
      %51 = vector.load %arg10[%c0_34, %c0_35] : memref<1x32xf32, #tpu.memory_space<vmem>>, vector<1x32xf32>
      %52 = vector.shape_cast %51 : vector<1x32xf32> to vector<32xf32>
      %c0_36 = arith.constant 0 : index
      %c0_37 = arith.constant 0 : index
      %53 = vector.load %arg11[%c0_36, %c0_37] : memref<1x32xf32, #tpu.memory_space<vmem>>, vector<1x32xf32>
      %54 = vector.shape_cast %53 : vector<1x32xf32> to vector<32xf32>
      %cst_38 = arith.constant dense<0.000000e+00> : vector<8xf32>
      %55 = vector.multi_reduction <add>, %50, %cst_38 [1] : vector<8x32xf32> to vector<8xf32>
      %56 = vector.shape_cast %55 : vector<8xf32> to vector<8x1xf32>
      %cst_39 = arith.constant 3.200000e+01 : f32
      %57 = vector.broadcast %cst_39 : f32 to vector<8x1xf32>
      %58 = arith.divf %56, %57 : vector<8x1xf32>
      %59 = vector.broadcast %58 : vector<8x1xf32> to vector<8x32xf32>
      %60 = arith.subf %50, %59 : vector<8x32xf32>
      %61 = arith.mulf %60, %60 : vector<8x32xf32>
      %cst_40 = arith.constant dense<0.000000e+00> : vector<8xf32>
      %62 = vector.multi_reduction <add>, %61, %cst_40 [1] : vector<8x32xf32> to vector<8xf32>
      %63 = vector.shape_cast %62 : vector<8xf32> to vector<8x1xf32>
      %cst_41 = arith.constant 3.200000e+01 : f32
      %64 = vector.broadcast %cst_41 : f32 to vector<8x1xf32>
      %65 = arith.divf %63, %64 : vector<8x1xf32>
      %66 = vector.broadcast %58 : vector<8x1xf32> to vector<8x32xf32>
      %67 = arith.subf %50, %66 : vector<8x32xf32>
      %cst_42 = arith.constant 9.99999974E-6 : f32
      %68 = vector.broadcast %cst_42 : f32 to vector<8x1xf32>
      %69 = arith.addf %65, %68 : vector<8x1xf32>
      %70 = math.rsqrt %69 : vector<8x1xf32>
      %71 = vector.broadcast %70 : vector<8x1xf32> to vector<8x32xf32>
      %72 = arith.mulf %67, %71 : vector<8x32xf32>
      %73 = vector.shape_cast %52 : vector<32xf32> to vector<1x32xf32>
      %74 = vector.broadcast %73 : vector<1x32xf32> to vector<8x32xf32>
      %75 = arith.mulf %72, %74 : vector<8x32xf32>
      %76 = vector.shape_cast %54 : vector<32xf32> to vector<1x32xf32>
      %77 = vector.broadcast %76 : vector<1x32xf32> to vector<8x32xf32>
      %78 = arith.addf %75, %77 : vector<8x32xf32>
      %79 = arith.truncf %78 : vector<8x32xf32> to vector<8x32xbf16>
      %c0_43 = arith.constant 0 : index
      %c0_44 = arith.constant 0 : index
      %80 = vector.load %arg12[%c0_43, %c0_44] : memref<32x64xbf16, #tpu.memory_space<vmem>>, vector<32x64xbf16>
      %cst_45 = arith.constant dense<0.000000e+00> : vector<8x64xf32>
      %81 = tpu.matmul %79, %80, %cst_45 {dimension_numbers = #tpu.dot_dimension_numbers<[1], [0], [0], [1], [0, 0, 1, 1], [], []>} : vector<8x32xbf16>, vector<32x64xbf16>, vector<8x64xf32> -> vector<8x64xf32>
      %c0_46 = arith.constant 0 : index
      %c0_47 = arith.constant 0 : index
      %82 = vector.load %arg13[%c0_46, %c0_47] : memref<1x64xf32, #tpu.memory_space<vmem>>, vector<1x64xf32>
      %83 = vector.shape_cast %82 : vector<1x64xf32> to vector<64xf32>
      %84 = vector.shape_cast %83 : vector<64xf32> to vector<1x64xf32>
      %85 = vector.broadcast %84 : vector<1x64xf32> to vector<8x64xf32>
      %86 = arith.addf %81, %85 : vector<8x64xf32>
      %cst_48 = arith.constant 5.000000e-01 : f32
      %87 = vector.broadcast %cst_48 : f32 to vector<8x64xf32>
      %88 = arith.mulf %87, %86 : vector<8x64xf32>
      %cst_49 = arith.constant 0.707106769 : f32
      %89 = vector.broadcast %cst_49 : f32 to vector<8x64xf32>
      %90 = arith.mulf %86, %89 : vector<8x64xf32>
      %91 = math.erf %90 : vector<8x64xf32>
      %cst_50 = arith.constant 1.000000e+00 : f32
      %92 = vector.broadcast %cst_50 : f32 to vector<8x64xf32>
      %93 = arith.addf %92, %91 : vector<8x64xf32>
      %94 = arith.mulf %88, %93 : vector<8x64xf32>
      %95 = arith.truncf %94 : vector<8x64xf32> to vector<8x64xbf16>
      %c0_51 = arith.constant 0 : index
      %c0_52 = arith.constant 0 : index
      %96 = vector.load %arg14[%c0_51, %c0_52] : memref<64x32xbf16, #tpu.memory_space<vmem>>, vector<64x32xbf16>
      %cst_53 = arith.constant dense<0.000000e+00> : vector<8x32xf32>
      %97 = tpu.matmul %95, %96, %cst_53 {dimension_numbers = #tpu.dot_dimension_numbers<[1], [0], [0], [1], [0, 0, 1, 1], [], []>} : vector<8x64xbf16>, vector<64x32xbf16>, vector<8x32xf32> -> vector<8x32xf32>
      %c0_54 = arith.constant 0 : index
      %c0_55 = arith.constant 0 : index
      %98 = vector.load %arg15[%c0_54, %c0_55] : memref<1x32xf32, #tpu.memory_space<vmem>>, vector<1x32xf32>
      %99 = vector.shape_cast %98 : vector<1x32xf32> to vector<32xf32>
      %100 = vector.shape_cast %99 : vector<32xf32> to vector<1x32xf32>
      %101 = vector.broadcast %100 : vector<1x32xf32> to vector<8x32xf32>
      %102 = arith.addf %97, %101 : vector<8x32xf32>
      %103 = arith.addf %50, %102 : vector<8x32xf32>
      %c0_56 = arith.constant 0 : index
      %c0_57 = arith.constant 0 : index
      %c0_58 = arith.constant 0 : index
      %104 = vector.load %arg16[%c0_56, %c0_57, %c0_58] : memref<1x8x32xf32, #tpu.memory_space<vmem>>, vector<1x8x32xf32>
      %105 = vector.shape_cast %104 : vector<1x8x32xf32> to vector<8x32xf32>
      %106 = vector.shape_cast %103 : vector<8x32xf32> to vector<1x8x32xf32>
      tpu.vector_store %arg16[%c0_56, %c0_57, %c0_58], %106 {strides = array<i32>} : memref<1x8x32xf32, #tpu.memory_space<vmem>>, vector<1x8x32xf32>,
    } else {
    }
    return
  }
  func.func @transform_0(%arg0: i32, %arg1: i32) -> (i32, i32, i32) {
    %c0_i32 = arith.constant 0 : i32
    %c0_i32_0 = arith.constant 0 : i32
    %c0_i32_1 = arith.constant 0 : i32
    return %arg0, %c0_i32, %c0_i32_0 : i32, i32, i32
  }
  func.func @transform_1(%arg0: i32, %arg1: i32) -> (i32, i32) {
    %c0_i32 = arith.constant 0 : i32
    %c0_i32_0 = arith.constant 0 : i32
    %c0_i32_1 = arith.constant 0 : i32
    return %c0_i32, %c0_i32_0 : i32, i32
  }
  func.func @transform_2(%arg0: i32, %arg1: i32) -> (i32, i32) {
    %c0_i32 = arith.constant 0 : i32
    %c0_i32_0 = arith.constant 0 : i32
    %c0_i32_1 = arith.constant 0 : i32
    return %c0_i32, %c0_i32_0 : i32, i32
  }
  func.func @transform_3(%arg0: i32, %arg1: i32) -> (i32, i32, i32) {
    %c0_i32 = arith.constant 0 : i32
    %c0_i32_0 = arith.constant 0 : i32
    %c0_i32_1 = arith.constant 0 : i32
    return %arg1, %c0_i32, %c0_i32_0 : i32, i32, i32
  }
  func.func @transform_4(%arg0: i32, %arg1: i32) -> (i32, i32, i32) {
    %c0_i32 = arith.constant 0 : i32
    %c0_i32_0 = arith.constant 0 : i32
    %c0_i32_1 = arith.constant 0 : i32
    return %arg1, %c0_i32, %c0_i32_0 : i32, i32, i32
  }
  func.func @transform_5(%arg0: i32, %arg1: i32) -> (i32, i32, i32) {
    %c0_i32 = arith.constant 0 : i32
    %c0_i32_0 = arith.constant 0 : i32
    %c0_i32_1 = arith.constant 0 : i32
    return %arg1, %c0_i32, %c0_i32_0 : i32, i32, i32
  }
  func.func @transform_6(%arg0: i32, %arg1: i32) -> (i32, i32, i32) {
    %c0_i32 = arith.constant 0 : i32
    %c0_i32_0 = arith.constant 0 : i32
    %c0_i32_1 = arith.constant 0 : i32
    return %arg1, %c0_i32, %c0_i32_0 : i32, i32, i32
  }
  func.func @transform_7(%arg0: i32, %arg1: i32) -> (i32, i32) {
    %c0_i32 = arith.constant 0 : i32
    %c0_i32_0 = arith.constant 0 : i32
    %c0_i32_1 = arith.constant 0 : i32
    return %c0_i32, %c0_i32_0 : i32, i32
  }
  func.func @transform_8(%arg0: i32, %arg1: i32) -> (i32, i32) {
    %c0_i32 = arith.constant 0 : i32
    %c0_i32_0 = arith.constant 0 : i32
    %c0_i32_1 = arith.constant 0 : i32
    return %c0_i32, %c0_i32_0 : i32, i32
  }
  func.func @transform_9(%arg0: i32, %arg1: i32) -> (i32, i32) {
    %c0_i32 = arith.constant 0 : i32
    %c0_i32_0 = arith.constant 0 : i32
    %c0_i32_1 = arith.constant 0 : i32
    return %c0_i32, %c0_i32_0 : i32, i32
  }
  func.func @transform_10(%arg0: i32, %arg1: i32) -> (i32, i32) {
    %c0_i32 = arith.constant 0 : i32
    %c0_i32_0 = arith.constant 0 : i32
    %c0_i32_1 = arith.constant 0 : i32
    return %c0_i32, %c0_i32_0 : i32, i32
  }
  func.func @transform_11(%arg0: i32, %arg1: i32) -> (i32, i32) {
    %c0_i32 = arith.constant 0 : i32
    %c0_i32_0 = arith.constant 0 : i32
    %c0_i32_1 = arith.constant 0 : i32
    return %c0_i32, %c0_i32_0 : i32, i32
  }
  func.func @transform_12(%arg0: i32, %arg1: i32) -> (i32, i32) {
    %c0_i32 = arith.constant 0 : i32
    %c0_i32_0 = arith.constant 0 : i32
    %c0_i32_1 = arith.constant 0 : i32
    return %c0_i32, %c0_i32_0 : i32, i32
  }
  func.func @transform_13(%arg0: i32, %arg1: i32) -> (i32, i32) {
    %c0_i32 = arith.constant 0 : i32
    %c0_i32_0 = arith.constant 0 : i32
    %c0_i32_1 = arith.constant 0 : i32
    return %c0_i32, %c0_i32_0 : i32, i32
  }
  func.func @transform_14(%arg0: i32, %arg1: i32) -> (i32, i32, i32) {
    %c0_i32 = arith.constant 0 : i32
    %c0_i32_0 = arith.constant 0 : i32
    %c0_i32_1 = arith.constant 0 : i32
    return %arg0, %c0_i32, %c0_i32_0 : i32, i32, i32
  }
}

</mosaic_0001>

<bundles_post_ra>
// kernel: tpu_custom_call.1
= control target key start
LH: loop header
LB: loop body
LE: loop exit
PB: predicated region body
PF: predicated region fallthrough
CT: control target
= control target key end

     0   :  { %s1896_s0 = inlined_call_operand.vmem [shape: f32[2,8,32], index: 0, kind: input, shape index: {}]   ;;  %s1897_s1 = inlined_call_operand.vmem [shape: f32[1,32], index: 1, kind: input, shape index: {}]   ;;  %s1898_s2 = inlined_call_operand.vmem [shape: f32[1,32], index: 2, kind: input, shape index: {}]   ;;  %s1899_s3 = inlined_call_operand.vmem [shape: bf16[4,32,8], index: 3, kind: input, shape index: {}]   ;;  %s1900_s4 = inlined_call_operand.vmem [shape: bf16[4,32,8], index: 4, kind: input, shape index: {}]   ;;  %s1901_s5 = inlined_call_operand.vmem [shape: bf16[4,32,8], index: 5, kind: input, shape index: {}]   ;;  %s1902_s6 = inlined_call_operand.vmem [shape: bf16[4,8,32], index: 6, kind: input, shape index: {}]   ;;  %s1903_s7 = inlined_call_operand.vmem [shape: f32[1,32], index: 7, kind: input, shape index: {}]   ;;  %s1904_s8 = inlined_call_operand.vmem [shape: f32[1,32], index: 8, kind: input, shape index: {}]   ;;  %s1905_s9 = inlined_call_operand.vmem [shape: f32[1,32], index: 9, kind: input, shape index: {}]   ;;  %s1906_s10 = inlined_call_operand.vmem [shape: bf16[32,64], index: 10, kind: input, shape index: {}]   ;;  %s1907_s11 = inlined_call_operand.vmem [shape: f32[1,64], index: 11, kind: input, shape index: {}]   ;;  %s1908_s12 = inlined_call_operand.vmem [shape: bf16[64,32], index: 12, kind: input, shape index: {}]   ;;  %s1909_s13 = inlined_call_operand.vmem [shape: f32[1,32], index: 13, kind: input, shape index: {}]   ;;  %s1910_s14 = inlined_call_operand.hbm [shape: f32[2,8,32], index: 14, kind: output, shape index: {}]  }
   0x1   :  { %1925 = sst [smem:[#allocation19_spill]] %s1896_s0 }
   0x2   :  { %1926 = sst [smem:[#allocation20_spill]] %s1909_s13 }
   0x3   :  { %1927 = sst [smem:[#allocation21_spill]] %s1910_s14 }
   0x4   :  { %19 = vsyncpa [#allocation5], 0 }
   0x5   :  { %21 = vsyncpa [#allocation5 + $0x1], 0  ;;  %s1670_s29 = smov 0   ;;  %s1672_s30 = smov 0  }
   0x6   :  { %s1674_s15 = smov 0   ;;  %s1676_s16 = smov 0  }
   0x7   :  { %s1678_s17 = smov 0   ;;  %s1680_s18 = smov 0  }
   0x8   :  { %s1682_s19 = smov 0   ;;  %s1684_s20 = smov 0  }
   0x9 LB: > { %1928 = sst [smem:[#allocation7_spill]] %s1559_s29  ;;  %s1262_s21 = sadd.s32 4294967295, %s1587_s20   ;;  %s1587_s20 = sphi %s1684_s20, %s27_s20   ;;  %s1583_s19 = sphi %s1682_s19, %s1958_s19   ;;  %s1579_s18 = sphi %s1680_s18, %s1957_s18   ;;  %s1575_s17 = sphi %s1678_s17, %s1956_s17   ;;  %s1571_s16 = sphi %s1676_s16, %s1955_s16   ;;  %s1567_s15 = sphi %s1674_s15, %s1954_s15   ;;  %s1563_s30 = sphi %s1672_s30, %s1953_s30   ;;  %s1559_s29 = sphi %s1670_s29, %s1952_s29  }
   0xa   : > { %1929 = sst [smem:[#allocation8_spill]] %s1563_s30  ;;  %s1263_s22 = sadd.s32 4294967294, %s1587_s20  }
   0xb   : > { %1930 = sst [smem:[#allocation9_spill]] %s1567_s15  ;;  %s36_s23 = sadd.s32 1, %s1579_s18 }
   0xc   : > { %1931 = sst [smem:[#allocation10_spill]] %s1575_s17  ;;  %p37_p0 = scmp.ge.s32.totalorder %s36_s23, 4 }
   0xd   : > { %1932 = sst [smem:[#allocation11_spill]] %s1579_s18  ;;  %s39_s24 = sadd.s32 1, %s1583_s19 }
   0xe   : > { %1933 = sst [smem:[#allocation12_spill]] %s1583_s19  ;;  %p375_p1 = scmp.ne.s32.totalorder %s1567_s15, %s1563_s30 }
   0xf   : > { %1934 = sst [smem:[#allocation13_spill]] %s1587_s20  ;;  %p376_p2 = scmp.eq.s32.totalorder %s1262_s21, 7 }
  0x10   : > { %s1960_s23 = smov (%p37_p0, %s36_s23), 0  ;;  %s1962_s24 = smov (!%p37_p0, %s39_s24), %s1583_s19 }
  0x11   : > { %1935 = sst [smem:[#allocation14_spill]] %s1960_s23  ;;  %p1719_p3 = por %p376_p2, %p375_p1 }
  0x12   : > { %p381_p4 = scmp.ne.s32.totalorder %s1563_s30, %s1559_s29  ;;  %p41_p5 = scmp.ge.s32.totalorder %s1962_s24, 2 }
  0x13   : > { %s1936_s25 = scalar_select %p1719_p3, 1, 0 }
  0x14   : > { %p382_p6 = scmp.eq.s32.totalorder %s1263_s22, 7  ;;  %p1266_p7 = scmp.ge.s32.totalorder %s1587_s20, 1 }
  0x15   : > { %1937 = sst [smem:[#allocation15_spill]] %s1936_s25  ;;  %p465_p8 = scmp.lt.s32.totalorder %s1587_s20, 9 }
  0x16   : > { %s1964_s24 = smov (%p41_p5, %s1962_s24), 0  ;;  %p1729_p9 = por %p382_p6, %p381_p4 }
  0x17   : > { %1938 = sst [smem:[#allocation16_spill]] %s1964_s24  ;;  %p466_p10 = pnand %p1266_p7, %p465_p8 }
  0x18   : > { %s1939_s26 = scalar_select %p1729_p9, 1, 0 }
  0x19   : > { %s362_s27 = ssub.s32 %s1583_s19, %s1964_s24  ;;  %s365_s28 = sadd.s32 1, %s1567_s15 }
  0x1a   : > { %1940 = sst [smem:[#allocation17_spill]] %s1939_s26  ;;  %p363_p11 = scmp.eq.s32.totalorder %s362_s27, 0 }
  0x1b   : > { %469 = sbr.rel (%p466_p10) target bundleno = 2070 (0x816), region = 76  ;;  %s1922_s22 = sand.u32 (!%p466_p10), 1, %s1563_s30  }
  0x1c   : > { %s1737_s21 = scalar_select %p363_p11, %s1567_s15, %s365_s28  }
  0x1d   : > { %p529_p12 = scmp.lt.s32.totalorder (!%p466_p10), %s1575_s17, 1  ;;  %s1743_s23 = sshll.u32 (!%p466_p10), %s1922_s22, 3 }
  0x1e   : > { %1941 = sst [smem:[#allocation18_spill]] %s1737_s21  ;;  %p533_p13 = scmp.lt.s32.totalorder (!%p466_p10), %s1571_s16, 3 }
  0x1f   : > { %s1942_s0 = sld [smem:[#allocation19_spill]] (!%p466_p10)  ;;  %p1276_p0 = scmp.ne.s32.totalorder (!%p466_p10), %s1571_s16, 0 }
  0x20   : > { %s530_s18 = scalar_select %p529_p12, %s1575_s17, 1 }
  0x21   : > { %s534_s24 = scalar_select %p533_p13, %s1571_s16, 3 }
  0x22   : > { %s1268_s19 = sshll.u32 %s530_s18, 3  ;;  %556 = sbr.rel (%p1276_p0) target bundleno = 351 (0x15f), region = 80 }
  0x23   : > { %s1309_s15 = sshll.u32 %s534_s24, 4  ;;  %s1275_s13 = sshll.u32 %s534_s24, 2 }
  0x24   : > { %s1756_s20 = scalar_lea.vmem %s1899_s3, %s1309_s15  ;;  %s1761_s22 = scalar_lea.vmem %s1900_s4, %s1309_s15 }
  0x25   : > { %s1751_s21 = scalar_lea.vmem %s1942_s0, %s1268_s19  ;;  %s1766_s18 = scalar_lea.vmem %s1901_s5, %s1309_s15 }
  0x26   : > { %s1771_s28 = scalar_lea.vmem %s1902_s6, %s1275_s13  ;;  %s528_s0 = scalar_lea.vmem [#allocation4], %s1743_s23 }
  0x27   : > { %v557_v0 = vld [vmem:[%s1751_s21] sm:$0xff]  ;;  %vm560_vm0 = vcmask 261120   ;;  %v1589_v2 = vmov 0.0   ;;  %vm590_vm1 = vcmask 257024  }
  0x28   : > { %v561_v1 = vsel %vm560_vm0, %v557_v0, 0.0  ;;  %592 = vst.msk [vmem:[#allocation3] sm:$0xff] %vm560_vm0, %v1589_v2  ;;  %v1277_v12 = vld [vmem:[%s1897_s1] ss:$0 sm:$0xff] }
  0x29   : > { %562 = vadd.xlane.f32.xlu0 %v561_v1  ;;  %v1278_v14 = vld [vmem:[%s1898_s2] ss:$0 sm:$0xff] }
  0xb2   : > { %v563_v3 = vpop.xlane.xlu0 %562 }
  0xb3   : > { %v565_v4 = vmul.f32 0.03125, %v563_v3 }
  0xb5   : > { %v566_v5 = vsub.f32 %v557_v0, %v565_v4 }
  0xb7   : > { %v567_v6 = vmul.f32 %v566_v5, %v566_v5 }
  0xb9   : > { %v568_v7 = vsel %vm560_vm0, %v567_v6, 0.0 }
  0xba   : > { %569 = vadd.xlane.f32.xlu0 %v568_v7 }
 0x143   : > { %v570_v8 = vpop.xlane.xlu0 %569 }
 0x144   : > { %v571_v9 = vmul.f32 0.03125, %v570_v8 }
 0x146   : > { %v572_v10 = vadd.f32 1e-05, %v571_v9 }
 0x148   : > { %1473 = vrsqrt.f32 %v572_v10 }
 0x155   : > { %v1474_v11 = vpop.eup %1473 }
 0x156   : > { %v574_v13 = vmul.f32 %v1474_v11, %v566_v5 }
 0x158   : > { %v581_v15 = vmul.f32 %v1277_v12, %v574_v13 }
 0x15a   : > { %v588_v16 = vadd.f32 %v1278_v14, %v581_v15 }
 0x15c   : > { %v589_v17 = vpack.c.bf16 %v588_v16, %v588_v16 }
 0x15e   : > { %591 = vst.msk [vmem:[#allocation2] sm:$0xf] %vm590_vm1, %v589_v17 }
 0x15f PF: > { %v1475_v18 = vld [vmem:[%s1761_s22 + $0x8] sm:$0xff]   ;;  %v1590_v19 = vmov 0.0   ;;  %v1477_v21 = vld [vmem:[%s1761_s22] sm:$0xff]   ;;  %vm1591_vm2 = vmmov 0   ;;  %vm610_vm3 = vcmask 261120   ;;  %vm769_vm4 = vcmask 64512  }
 0x160   : > { %1343 = vmatprep.subr.bf16.mxu1 %v1590_v19  ;;  %1335 = vmatprep.subr.bf16.mxu0 %v1590_v19  ;;  %v1476_v20 = vld [vmem:[%s1756_s20 + $0x8] sm:$0xff]   ;;  %v1478_v22 = vld [vmem:[%s1756_s20] sm:$0xff]   ;;  %vm830_vm5 = vcmask 1043456   ;;  %p1291_p1 = scmp.ne.s32.totalorder %s1571_s16, 3 }
 0x161   : > { %1344 = vmatpush3.bf16.msra.mxu1 %v1475_v18  ;;  %1347 = vmatprep.mubr.msk.bf16.mxu1 %vm1591_vm2, %v1590_v19  ;;  %v1479_v24 = vld [vmem:[%s1766_s18 + $0x8] sm:$0xff]   ;;  %v1480_v25 = vld [vmem:[%s1766_s18] sm:$0xff]   ;;  %s1943_s25 = sld [smem:[#allocation20_spill]] (!%p1291_p1) }
 0x162   : > { %1336 = vmatpush3.bf16.msra.mxu0 %v1476_v20  ;;  %1345 = vmatprep.subr.bf16.mxu1 %v1590_v19  ;;  %v878_v55 = vld [vmem:[%s1771_s28] sm:$0xf]  ;;  %v876_v1 = vld [vmem:[#allocation3] sm:$0xff] }
 0x163   : > { %1337 = vmatprep.subr.bf16.mxu0 %v1590_v19  ;;  %1339 = vmatprep.mubr.msk.bf16.mxu0 %vm1591_vm2, %v1590_v19  ;;  %v883_v56 = vsel %vm830_vm5, %v878_v55, 0 }
 0x165   : > { %1346 = vmatpush3.bf16.msra.mxu1 %v1477_v21  ;;  %v593_v23 = vld [vmem:[#allocation2] sm:$0xf] }
 0x166   : > { %1338 = vmatpush3.bf16.msra.mxu0 %v1478_v22  ;;  %1359 = vmatprep.subr.bf16.mxu1 %v1590_v19 }
 0x167   : > { %1351 = vmatprep.subr.bf16.mxu0 %v1590_v19 }
 0x168   : > { %1348 = vmatmul.mubr.msk.bf16.vlgmr.msra.gmra.mxu1 %vm610_vm3, %v593_v23 }
 0x169   : > { %1340 = vmatmul.mubr.msk.bf16.vlgmr.msra.gmra.mxu0 %vm610_vm3, %v593_v23  ;;  %1361 = vmatprep.mubr.msk.bf16.mxu1 %vm1591_vm2, %v1590_v19 }
 0x16a   : > { %1355 = vmatprep.mubr.msk.bf16.mxu0 %vm1591_vm2, %v1590_v19  ;;  %1352 = vmatpush3.bf16.msra.mxu0 %v1479_v24 }
 0x16b   : > { %1353 = vmatprep.subr.bf16.mxu0 %v1590_v19 }
 0x16e   : > { %1354 = vmatpush3.bf16.msra.mxu0 %v1480_v25 }
 0x16f   : > { %1365 = vmatprep.subr.bf16.mxu0 %v1590_v19 }
 0x171   : > { %1356 = vmatmul.mubr.msk.bf16.vlgmr.msra.gmra.mxu0 %vm610_vm3, %v593_v23 }
 0x172   : > { %1367 = vmatprep.mubr.msk.bf16.mxu0 %vm1591_vm2, %v1590_v19 }
 0x228   : > { %v705_v26 = vpop.f32.mrf.mxu1 }
 0x229   : > { %v768_v27 = vpack.c.bf16 %v705_v26, %v705_v26  ;;  %v648_v28 = vpop.f32.mrf.mxu0 }
 0x22a   : > { %v1349_v29 = vpop.f32.mrf.mxu1  ;;  %v654_v31 = vmul.f32 0.17677669, %v648_v28 }
 0x22b   : > { %v774_v30 = vsel %vm769_vm4, %v768_v27, 0  ;;  %v1341_v32 = vpop.f32.mrf.mxu0 }
 0x22c   : > { %v708_v33 = vpop.f32.mrf.mxu1  ;;  %1360 = vmatpush3.bf16.xpose.msra.mxu1 %v774_v30  ;;  %v767_v36 = vpack.c.bf16 %v654_v31, %v654_v31 }
 0x22d   : > { %v651_v34 = vpop.f32.mrf.mxu0  ;;  %1371 = vmatprep.subr.bf16.mxu1 %v1590_v19 }
 0x22e   : > { %v1350_v35 = vpop.f32.mrf.mxu1 }
 0x22f   : > { %v1342_v37 = vpop.f32.mrf.mxu0 }
 0x231   : > { %v761_v43 = vpop.f32.mrf.mxu0 }
 0x232   : > { %v826_v44 = vpack.c.bf16 %v761_v43, %v761_v43 }
 0x233   : > { %1362 = vmatmul.mubr.msk.bf16.vlgmr.msra.gmra.mxu1 %vm769_vm4, %v767_v36  ;;  %v1357_v45 = vpop.f32.mrf.mxu0 }
 0x234   : > { %1373 = vmatprep.mubr.msk.bf16.mxu1 %vm1591_vm2, %v1590_v19  ;;  %v832_v46 = vsel %vm830_vm5, %v826_v44, 0  ;;  %1372 = vmatpush3.bf16.msra.mxu1 %v883_v56 }
 0x235   : > { %v764_v47 = vpop.f32.mrf.mxu0  ;;  %1366 = vmatpush3.bf16.msra.mxu0 %v832_v46 }
 0x237   : > { %v1358_v48 = vpop.f32.mrf.mxu0 }
 0x2f3   : > { %v810_v38 = vpop.f32.mrf.mxu1 }
 0x2f4   : > { %v816_v39 = vsel %vm769_vm4, %v810_v38, -inf }
 0x2f5   : > { %817 = vmax.xlane.f32.xlu0 %v816_v39  ;;  %v1363_v40 = vpop.f32.mrf.mxu1 }
 0x2f7   : > { %v813_v41 = vpop.f32.mrf.mxu1 }
 0x2f9   : > { %v1364_v42 = vpop.f32.mrf.mxu1 }
 0x37e   : > { %v818_v49 = vpop.xlane.xlu0 %817 }
 0x37f   : > { %v819_v50 = vsub.f32 %v810_v38, %v818_v49 }
 0x381   : > { %v820_v51 = vmul.f32 1.442695, %v819_v50 }
 0x383   : > { %1481 = vpow2.f32 %v820_v51 }
 0x390   : > { %v1482_v52 = vpop.eup %1481 }
 0x391   : > { %v822_v53 = vsel %vm769_vm4, %v1482_v52, 0.0  ;;  %v825_v54 = vpack.c.bf16 %v1482_v52, %v1482_v52 }
 0x392   : > { %823 = vadd.xlane.f32.xlu0 %v822_v53 }
 0x393   : > { %1368 = vmatmul.mubr.msk.bf16.vlgmr.msra.gmra.mxu0 %vm769_vm4, %v825_v54 }
 0x41b   : > { %v824_v57 = vpop.xlane.xlu0 %823 }
 0x41c   : > { %1483 = vrcp.f32 %v824_v57 }
 0x429   : > { %v1484_v58 = vpop.eup %1483 }
 0x453   : > { %v868_v59 = vpop.f32.mrf.mxu0 }
 0x454   : > { %v875_v60 = vmul.f32 %v1484_v58, %v868_v59 }
 0x455   : > { %v1369_v61 = vpop.f32.mrf.mxu0 }
 0x456   : > { %v877_v62 = vpack.c.bf16 %v875_v60, %v875_v60 }
 0x457   : > { %v871_v63 = vpop.f32.mrf.mxu0 }
 0x458   : > { %1374 = vmatmul.mubr.msk.bf16.vlgmr.msra.gmra.mxu1 %vm769_vm4, %v877_v62 }
 0x459   : > { %v1370_v0 = vpop.f32.mrf.mxu0 }
 0x518   : > { %v919_v2 = vpop.f32.mrf.mxu1 }
 0x519   : > { %v925_v3 = vadd.f32 %v919_v2, %v876_v1 }
 0x51a   : > { %v1375_v4 = vpop.f32.mrf.mxu1  ;;  %930 = sbr.rel (%p1291_p1) target bundleno = 2045 (0x7fd), region = 84 }
 0x51b   : > { %926 = vst.msk [vmem:[#allocation3] sm:$0xff] %vm610_vm3, %v925_v3 }
 0x51c   : > { %v922_v5 = vpop.f32.mrf.mxu1 }
 0x51e   : > { %v1376_v6 = vpop.f32.mrf.mxu1 }
 0x51f   : > { %v931_v7 = vld [vmem:[%s1751_s21] sm:$0xff]  ;;  %v1485_v18 = vld [vmem:[%s1906_s10 + $0x8] sm:$0xff]   ;;  %v1592_v19 = vmov 0.0   ;;  %vm1593_vm6 = vmmov 0   ;;  %v1487_v31 = vld [vmem:[%s1908_s12 + $0x18] sm:$0xff]   ;;  %vm1084_vm7 = vcmask 523264  }
 0x520   : > { %v1292_v9 = vld [vmem:[%s1903_s7] ss:$0 sm:$0xff]  ;;  %1377 = vmatprep.subr.bf16.mxu0 %v1592_v19  ;;  %1381 = vmatprep.mubr.msk.bf16.mxu0 %vm1593_vm6, %v1592_v19  ;;  %v1488_v32 = vld [vmem:[%s1908_s12 + $0x10] sm:$0xff]   ;;  %v1489_v33 = vld [vmem:[%s1908_s12 + $0x8] sm:$0xff]  }
 0x521   : > { %1378 = vmatpush3.bf16.msra.mxu0 %v1485_v18  ;;  %v1486_v20 = vld [vmem:[%s1906_s10] sm:$0xff]   ;;  %1385 = vmatprep.subr.bf16.mxu1 %v1592_v19 }
 0x522   : > { %v932_v8 = vld [vmem:[#allocation3] sm:$0xff]  ;;  %1379 = vmatprep.subr.bf16.mxu0 %v1592_v19  ;;  %1393 = vmatprep.mubr.msk.bf16.mxu1 %vm1593_vm6, %v1592_v19  ;;  %v1293_v25 = vld [vmem:[%s1904_s8] ss:$0 sm:$0xff] }
 0x523   : > { %v933_v10 = vadd.f32 %v932_v8, %v931_v7  ;;  %v1294_v27 = vld [vmem:[%s1905_s9] ss:$0 sm:$0xff]  ;;  %1386 = vmatpush3.bf16.msra.mxu1 %v1487_v31 }
 0x524   : > { %1387 = vmatprep.subr.bf16.mxu1 %v1592_v19  ;;  %v1490_v34 = vld [vmem:[%s1908_s12] sm:$0xff]  }
 0x525   : > { %v941_v11 = vadd.f32 %v1292_v9, %v933_v10  ;;  %1380 = vmatpush3.bf16.msra.mxu0 %v1486_v20  ;;  %v1295_v35 = vld [vmem:[%s1907_s11] ss:$0 sm:$0xff] }
 0x526   : > { %v1299_v47 = vld [vmem:[%s1943_s25] ss:$0 sm:$0xff] }
 0x527   : > { %v944_v12 = vsel %vm610_vm3, %v941_v11, 0.0  ;;  %1388 = vmatpush3.bf16.msra.mxu1 %v1488_v32 }
 0x528   : > { %945 = vadd.xlane.f32.xlu0 %v944_v12  ;;  %1389 = vmatprep.subr.bf16.mxu1 %v1592_v19 }
 0x52b   : > { %1390 = vmatpush3.bf16.msra.mxu1 %v1489_v33 }
 0x52c   : > { %1391 = vmatprep.subr.bf16.mxu1 %v1592_v19 }
 0x52f   : > { %1392 = vmatpush3.bf16.msra.mxu1 %v1490_v34 }
 0x5b1   : > { %v946_v13 = vpop.xlane.xlu0 %945 }
 0x5b2   : > { %v948_v14 = vmul.f32 0.03125, %v946_v13 }
 0x5b4   : > { %v949_v15 = vsub.f32 %v941_v11, %v948_v14 }
 0x5b6   : > { %v950_v16 = vmul.f32 %v949_v15, %v949_v15 }
 0x5b8   : > { %v951_v17 = vsel %vm610_vm3, %v950_v16, 0.0 }
 0x5b9   : > { %952 = vadd.xlane.f32.xlu0 %v951_v17 }
 0x642   : > { %v953_v21 = vpop.xlane.xlu0 %952 }
 0x643   : > { %v954_v22 = vmul.f32 0.03125, %v953_v21 }
 0x645   : > { %v955_v23 = vadd.f32 1e-05, %v954_v22 }
 0x647   : > { %1491 = vrsqrt.f32 %v955_v23 }
 0x654   : > { %v1492_v24 = vpop.eup %1491 }
 0x655   : > { %v957_v26 = vmul.f32 %v1492_v24, %v949_v15 }
 0x657   : > { %v964_v28 = vmul.f32 %v1293_v25, %v957_v26 }
 0x659   : > { %v971_v29 = vadd.f32 %v1294_v27, %v964_v28 }
 0x65b   : > { %v972_v30 = vpack.c.bf16 %v971_v29, %v971_v29 }
 0x65d   : > { %1382 = vmatmul.mubr.msk.bf16.vlgmr.msra.gmra.mxu0 %vm610_vm3, %v972_v30 }
 0x71d   : > { %v1033_v36 = vpop.f32.mrf.mxu0 }
 0x71e   : > { %v1034_v37 = vadd.f32 %v1295_v35, %v1033_v36 }
 0x71f   : > { %v1383_v38 = vpop.f32.mrf.mxu0 }
 0x720   : > { %v1040_v39 = vmul.f32 0.70710677, %v1034_v37  ;;  %v1039_v43 = vmul.f32 0.5, %v1034_v37 }
 0x721   : > { %v1036_v40 = vpop.f32.mrf.mxu0 }
 0x722   : > { %1493 = verf.f32 %v1040_v39 }
 0x723   : > { %v1384_v41 = vpop.f32.mrf.mxu0 }
 0x72f   : > { %v1494_v42 = vpop.eup %1493 }
 0x730   : > { %v1042_v44 = vadd.f32 1.0, %v1494_v42 }
 0x732   : > { %v1043_v45 = vmul.f32 %v1042_v44, %v1039_v43 }
 0x734   : > { %v1044_v46 = vpack.c.bf16 %v1043_v45, %v1043_v45 }
 0x736   : > { %1394 = vmatmul.mubr.msk.bf16.vlgmr.msra.gmra.mxu1 %vm1084_vm7, %v1044_v46 }
 0x7f6   : > { %v1122_v48 = vpop.f32.mrf.mxu1 }
 0x7f7   : > { %v1123_v49 = vadd.f32 %v1299_v47, %v1122_v48 }
 0x7f8   : > { %v1395_v50 = vpop.f32.mrf.mxu1 }
 0x7f9   : > { %v1128_v51 = vadd.f32 %v1123_v49, %v941_v11 }
 0x7fa   : > { %v1125_v52 = vpop.f32.mrf.mxu1 }
 0x7fb   : > { %1129 = vst.msk [vmem:[%s528_s0] sm:$0xff] %vm610_vm3, %v1128_v51 }
 0x7fc   : > { %v1396_v53 = vpop.f32.mrf.mxu1 }
 0x7fd PF: > { %s1944_s26 = sld [smem:[#allocation10_spill]]  ;;  %s1144_s14 = sshll.u32 %s528_s0, 4  ;;  %s1145_s14 = int_to_ptr.vmem [resolvable:$true] %s1144_s14 }
 0x7fe   : > { %s1945_s21 = sld [smem:[#allocation8_spill]]  ;;  %s1495_s15 = scalar_lea.vmem %s1145_s14, 128 }
 0x7ff   : > { %s1947_s28 = sld [smem:[#allocation21_spill]]  ;;  %p1496_p2 = scmp.ne.s32.totalorder %s1145_s14, %s1495_s15 }
 0x800   : > { %s1594_s17 = smov [#allocation4]  }
 0x801   : > { %p1497_p4 = pnand %p1496_p2, %p1719_p3  ;;  %s1499_s16 = sshll.u32 %s1594_s17, 4  ;;  %s1500_s16 = int_to_ptr.vmem [resolvable:$false] %s1499_s16 }
 0x802   : > { %s1501_s20 = scalar_lea.vmem %s1500_s16, 256  ;;  %p1502_p6 = scmp.lt.s32.totalorder %s1145_s14, %s1500_s16 }
 0x803   : > { %s1306_s18 = sshll.u32 %s1944_s26, 7  ;;  %p1498_p5 = pneg %p1497_p4 }
 0x804   : > { %s1948_s29 = sand.u32 1, %s1945_s21   ;;  %p1503_p7 = scmp.lt.s32.totalorder %s1501_s20, %s1495_s15 }
 0x805   : > { %s1142_s13 = scalar_lea.hbm %s1947_s28, %s1306_s18  ;;  %s1131_s30 = scalar_lea.sflag [#allocation5], %s1948_s29 }
 0x806   : > { %p1504_p8 = por %p1503_p7, %p1502_p6 }
 0x808   : > { %p1505_p10 = pnand %p1504_p8, %p1498_p5 }
 0x80a   : > { %1508 = shalt.err (!%p1505_p10)
}
 0x80b   : > { %s1509_s24 = scalar_lea.hbm %s1142_s13, 128  ;;  %s1513_s25 = scalar_lea.hbm %s1947_s28, 256 }
 0x80c   : > { %p1510_p11 = scmp.ne.s32.totalorder %s1142_s13, %s1509_s24  ;;  %p1514_p0 = scmp.lt.s32.totalorder %s1142_s13, %s1947_s28 }
 0x80d   : > { %p1515_p1 = scmp.lt.s32.totalorder %s1513_s25, %s1509_s24 }
 0x80e   : > { %p1511_p12 = pnand %p1510_p11, %p1719_p3 }
 0x80f   : > { %p1516_p2 = por %p1515_p1, %p1514_p0 }
 0x810   : > { %p1512_p13 = pneg %p1511_p12 }
 0x812   : > { %p1517_p4 = pnand %p1516_p2, %p1512_p13 }
 0x814   : > { %1520 = shalt.err (!%p1517_p4)
}
 0x815   : > { %1397 = dma.vmem_to_hbm [thread:$0]  (%p1719_p3), %s1145_s14, 128, %s1142_s13, %s1131_s30  }
 0x816 PF: > { %s1949_s18 = sld [smem:[#allocation13_spill]] }
 0x817   : > { %s1950_s27 = sld [smem:[#allocation7_spill]] }
 0x81c   : > { %p1403_p5 = scmp.ge.s32.totalorder %s1949_s18, 2 }
 0x81d   : > { %s1156_s29 = sand.u32 1, %s1950_s27  }
 0x81e   : > { %p1400_p6 = pnand %p1403_p5, %p1729_p9  ;;  %s1157_s15 = scalar_lea.sflag [#allocation5], %s1156_s29 }
 0x820   : > { %p1401_p7 = pneg %p1400_p6 }
 0x822   : > { %1554 = dma.done.wait (%p1401_p7), %s1157_s15, 128  }
 0x823   : > { %1556 = vsyncadd (%p1401_p7), %s1157_s15, 4294967168  ;;  %s27_s20 = sadd.s32 1, %s1949_s18   ;;  %s1952_s29 = sld [smem:[#allocation8_spill]] }
 0x824   : > { %p24_p8 = scmp.ge.s32.totalorder %s27_s20, 10   ;;  %s1953_s30 = sld [smem:[#allocation9_spill]] }
 0x825   : > { %s1954_s15 = sld [smem:[#allocation18_spill]] }
 0x826   : > { %s1955_s16 = sld [smem:[#allocation11_spill]]  ;;  %26 = sbr.rel (!%p24_p8) target bundleno = 9 (0x9), region = 131 }
 0x827   : > { %s1956_s17 = sld [smem:[#allocation12_spill]] }
 0x828   : > { %s1957_s18 = sld [smem:[#allocation14_spill]] }
 0x829   : > { %s1958_s19 = sld [smem:[#allocation16_spill]] }
 0x82b   :  { %1162 = vsyncpa [#allocation5], 1 }
 0x82c   :  { %1164 = vsyncpa [#allocation5 + $0x1], 1 }

// kernel: tpu_custom_call.1
= control target key start
LH: loop header
LB: loop body
LE: loop exit
PB: predicated region body
PF: predicated region fallthrough
CT: control target
= control target key end

     0   :  { %s1896_s0 = inlined_call_operand.vmem [shape: f32[2,8,32], index: 0, kind: input, shape index: {}]   ;;  %s1897_s1 = inlined_call_operand.vmem [shape: f32[1,32], index: 1, kind: input, shape index: {}]   ;;  %s1898_s2 = inlined_call_operand.vmem [shape: f32[1,32], index: 2, kind: input, shape index: {}]   ;;  %s1899_s3 = inlined_call_operand.vmem [shape: bf16[4,32,8], index: 3, kind: input, shape index: {}]   ;;  %s1900_s4 = inlined_call_operand.vmem [shape: bf16[4,32,8], index: 4, kind: input, shape index: {}]   ;;  %s1901_s5 = inlined_call_operand.vmem [shape: bf16[4,32,8], index: 5, kind: input, shape index: {}]   ;;  %s1902_s6 = inlined_call_operand.vmem [shape: bf16[4,8,32], index: 6, kind: input, shape index: {}]   ;;  %s1903_s7 = inlined_call_operand.vmem [shape: f32[1,32], index: 7, kind: input, shape index: {}]   ;;  %s1904_s8 = inlined_call_operand.vmem [shape: f32[1,32], index: 8, kind: input, shape index: {}]   ;;  %s1905_s9 = inlined_call_operand.vmem [shape: f32[1,32], index: 9, kind: input, shape index: {}]   ;;  %s1906_s10 = inlined_call_operand.vmem [shape: bf16[32,64], index: 10, kind: input, shape index: {}]   ;;  %s1907_s11 = inlined_call_operand.vmem [shape: f32[1,64], index: 11, kind: input, shape index: {}]   ;;  %s1908_s12 = inlined_call_operand.vmem [shape: bf16[64,32], index: 12, kind: input, shape index: {}]   ;;  %s1909_s13 = inlined_call_operand.vmem [shape: f32[1,32], index: 13, kind: input, shape index: {}]   ;;  %s1910_s14 = inlined_call_operand.hbm [shape: f32[2,8,32], index: 14, kind: output, shape index: {}]  }
   0x1   :  { %1925 = sst [smem:[#allocation19_spill]] %s1896_s0 }
   0x2   :  { %1926 = sst [smem:[#allocation20_spill]] %s1909_s13 }
   0x3   :  { %1927 = sst [smem:[#allocation21_spill]] %s1910_s14 }
   0x4   :  { %19 = vsyncpa [#allocation5], 0 }
   0x5   :  { %21 = vsyncpa [#allocation5 + $0x1], 0  ;;  %s1670_s29 = smov 0   ;;  %s1672_s30 = smov 0  }
   0x6   :  { %s1674_s15 = smov 0   ;;  %s1676_s16 = smov 0  }
   0x7   :  { %s1678_s17 = smov 0   ;;  %s1680_s18 = smov 0  }
   0x8   :  { %s1682_s19 = smov 0   ;;  %s1684_s20 = smov 0  }
   0x9 LB: > { %1928 = sst [smem:[#allocation7_spill]] %s1559_s29  ;;  %s1262_s21 = sadd.s32 4294967295, %s1587_s20   ;;  %s1587_s20 = sphi %s1684_s20, %s27_s20   ;;  %s1583_s19 = sphi %s1682_s19, %s1958_s19   ;;  %s1579_s18 = sphi %s1680_s18, %s1957_s18   ;;  %s1575_s17 = sphi %s1678_s17, %s1956_s17   ;;  %s1571_s16 = sphi %s1676_s16, %s1955_s16   ;;  %s1567_s15 = sphi %s1674_s15, %s1954_s15   ;;  %s1563_s30 = sphi %s1672_s30, %s1953_s30   ;;  %s1559_s29 = sphi %s1670_s29, %s1952_s29  }
   0xa   : > { %1929 = sst [smem:[#allocation8_spill]] %s1563_s30  ;;  %s1263_s22 = sadd.s32 4294967294, %s1587_s20  }
   0xb   : > { %1930 = sst [smem:[#allocation9_spill]] %s1567_s15  ;;  %s36_s23 = sadd.s32 1, %s1579_s18 }
   0xc   : > { %1931 = sst [smem:[#allocation10_spill]] %s1575_s17  ;;  %p37_p0 = scmp.ge.s32.totalorder %s36_s23, 4 }
   0xd   : > { %1932 = sst [smem:[#allocation11_spill]] %s1579_s18  ;;  %s39_s24 = sadd.s32 1, %s1583_s19 }
   0xe   : > { %1933 = sst [smem:[#allocation12_spill]] %s1583_s19  ;;  %p375_p1 = scmp.ne.s32.totalorder %s1567_s15, %s1563_s30 }
   0xf   : > { %1934 = sst [smem:[#allocation13_spill]] %s1587_s20  ;;  %p376_p2 = scmp.eq.s32.totalorder %s1262_s21, 7 }
  0x10   : > { %s1960_s23 = smov (%p37_p0, %s36_s23), 0  ;;  %s1962_s24 = smov (!%p37_p0, %s39_s24), %s1583_s19 }
  0x11   : > { %1935 = sst [smem:[#allocation14_spill]] %s1960_s23  ;;  %p1719_p3 = por %p376_p2, %p375_p1 }
  0x12   : > { %p381_p4 = scmp.ne.s32.totalorder %s1563_s30, %s1559_s29  ;;  %p41_p5 = scmp.ge.s32.totalorder %s1962_s24, 2 }
  0x13   : > { %s1936_s25 = scalar_select %p1719_p3, 1, 0 }
  0x14   : > { %p382_p6 = scmp.eq.s32.totalorder %s1263_s22, 7  ;;  %p1266_p7 = scmp.ge.s32.totalorder %s1587_s20, 1 }
  0x15   : > { %1937 = sst [smem:[#allocation15_spill]] %s1936_s25  ;;  %p465_p8 = scmp.lt.s32.totalorder %s1587_s20, 9 }
  0x16   : > { %s1964_s24 = smov (%p41_p5, %s1962_s24), 0  ;;  %p1729_p9 = por %p382_p6, %p381_p4 }
  0x17   : > { %1938 = sst [smem:[#allocation16_spill]] %s1964_s24  ;;  %p466_p10 = pnand %p1266_p7, %p465_p8 }
  0x18   : > { %s1939_s26 = scalar_select %p1729_p9, 1, 0 }
  0x19   : > { %s362_s27 = ssub.s32 %s1583_s19, %s1964_s24  ;;  %s365_s28 = sadd.s32 1, %s1567_s15 }
  0x1a   : > { %1940 = sst [smem:[#allocation17_spill]] %s1939_s26  ;;  %p363_p11 = scmp.eq.s32.totalorder %s362_s27, 0 }
  0x1b   : > { %469 = sbr.rel (%p466_p10) target bundleno = 2070 (0x816), region = 76  ;;  %s1922_s22 = sand.u32 (!%p466_p10), 1, %s1563_s30  }
  0x1c   : > { %s1737_s21 = scalar_select %p363_p11, %s1567_s15, %s365_s28  }
  0x1d   : > { %p529_p12 = scmp.lt.s32.totalorder (!%p466_p10), %s1575_s17, 1  ;;  %s1743_s23 = sshll.u32 (!%p466_p10), %s1922_s22, 3 }
  0x1e   : > { %1941 = sst [smem:[#allocation18_spill]] %s1737_s21  ;;  %p533_p13 = scmp.lt.s32.totalorder (!%p466_p10), %s1571_s16, 3 }
  0x1f   : > { %s1942_s0 = sld [smem:[#allocation19_spill]] (!%p466_p10)  ;;  %p1276_p0 = scmp.ne.s32.totalorder (!%p466_p10), %s1571_s16, 0 }
  0x20   : > { %s530_s18 = scalar_select %p529_p12, %s1575_s17, 1 }
  0x21   : > { %s534_s24 = scalar_select %p533_p13, %s1571_s16, 3 }
  0x22   : > { %s1268_s19 = sshll.u32 %s530_s18, 3  ;;  %556 = sbr.rel (%p1276_p0) target bundleno = 351 (0x15f), region = 80 }
  0x23   : > { %s1309_s15 = sshll.u32 %s534_s24, 4  ;;  %s1275_s13 = sshll.u32 %s534_s24, 2 }
  0x24   : > { %s1756_s20 = scalar_lea.vmem %s1899_s3, %s1309_s15  ;;  %s1761_s22 = scalar_lea.vmem %s1900_s4, %s1309_s15 }
  0x25   : > { %s1751_s21 = scalar_lea.vmem %s1942_s0, %s1268_s19  ;;  %s1766_s18 = scalar_lea.vmem %s1901_s5, %s1309_s15 }
  0x26   : > { %s1771_s28 = scalar_lea.vmem %s1902_s6, %s1275_s13  ;;  %s528_s0 = scalar_lea.vmem [#allocation4], %s1743_s23 }
  0x27   : > { %v557_v0 = vld [vmem:[%s1751_s21] sm:$0xff]  ;;  %vm560_vm0 = vcmask 261120   ;;  %v1589_v2 = vmov 0.0   ;;  %vm590_vm1 = vcmask 257024  }
  0x28   : > { %v561_v1 = vsel %vm560_vm0, %v557_v0, 0.0  ;;  %592 = vst.msk [vmem:[#allocation3] sm:$0xff] %vm560_vm0, %v1589_v2  ;;  %v1277_v12 = vld [vmem:[%s1897_s1] ss:$0 sm:$0xff] }
  0x29   : > { %562 = vadd.xlane.f32.xlu0 %v561_v1  ;;  %v1278_v14 = vld [vmem:[%s1898_s2] ss:$0 sm:$0xff] }
  0xb2   : > { %v563_v3 = vpop.xlane.xlu0 %562 }
  0xb3   : > { %v565_v4 = vmul.f32 0.03125, %v563_v3 }
  0xb5   : > { %v566_v5 = vsub.f32 %v557_v0, %v565_v4 }
  0xb7   : > { %v567_v6 = vmul.f32 %v566_v5, %v566_v5 }
  0xb9   : > { %v568_v7 = vsel %vm560_vm0, %v567_v6, 0.0 }
  0xba   : > { %569 = vadd.xlane.f32.xlu0 %v568_v7 }
 0x143   : > { %v570_v8 = vpop.xlane.xlu0 %569 }
 0x144   : > { %v571_v9 = vmul.f32 0.03125, %v570_v8 }
 0x146   : > { %v572_v10 = vadd.f32 1e-05, %v571_v9 }
 0x148   : > { %1473 = vrsqrt.f32 %v572_v10 }
 0x155   : > { %v1474_v11 = vpop.eup %1473 }
 0x156   : > { %v574_v13 = vmul.f32 %v1474_v11, %v566_v5 }
 0x158   : > { %v581_v15 = vmul.f32 %v1277_v12, %v574_v13 }
 0x15a   : > { %v588_v16 = vadd.f32 %v1278_v14, %v581_v15 }
 0x15c   : > { %v589_v17 = vpack.c.bf16 %v588_v16, %v588_v16 }
 0x15e   : > { %591 = vst.msk [vmem:[#allocation2] sm:$0xf] %vm590_vm1, %v589_v17 }
 0x15f PF: > { %v1475_v18 = vld [vmem:[%s1761_s22 + $0x8] sm:$0xff]   ;;  %v1590_v19 = vmov 0.0   ;;  %v1477_v21 = vld [vmem:[%s1761_s22] sm:$0xff]   ;;  %vm1591_vm2 = vmmov 0   ;;  %vm610_vm3 = vcmask 261120   ;;  %vm769_vm4 = vcmask 64512  }
 0x160   : > { %1343 = vmatprep.subr.bf16.mxu1 %v1590_v19  ;;  %1335 = vmatprep.subr.bf16.mxu0 %v1590_v19  ;;  %v1476_v20 = vld [vmem:[%s1756_s20 + $0x8] sm:$0xff]   ;;  %v1478_v22 = vld [vmem:[%s1756_s20] sm:$0xff]   ;;  %vm830_vm5 = vcmask 1043456   ;;  %p1291_p1 = scmp.ne.s32.totalorder %s1571_s16, 3 }
 0x161   : > { %1344 = vmatpush3.bf16.msra.mxu1 %v1475_v18  ;;  %1347 = vmatprep.mubr.msk.bf16.mxu1 %vm1591_vm2, %v1590_v19  ;;  %v1479_v24 = vld [vmem:[%s1766_s18 + $0x8] sm:$0xff]   ;;  %v1480_v25 = vld [vmem:[%s1766_s18] sm:$0xff]   ;;  %s1943_s25 = sld [smem:[#allocation20_spill]] (!%p1291_p1) }
 0x162   : > { %1336 = vmatpush3.bf16.msra.mxu0 %v1476_v20  ;;  %1345 = vmatprep.subr.bf16.mxu1 %v1590_v19  ;;  %v878_v55 = vld [vmem:[%s1771_s28] sm:$0xf]  ;;  %v876_v1 = vld [vmem:[#allocation3] sm:$0xff] }
 0x163   : > { %1337 = vmatprep.subr.bf16.mxu0 %v1590_v19  ;;  %1339 = vmatprep.mubr.msk.bf16.mxu0 %vm1591_vm2, %v1590_v19  ;;  %v883_v56 = vsel %vm830_vm5, %v878_v55, 0 }
 0x165   : > { %1346 = vmatpush3.bf16.msra.mxu1 %v1477_v21  ;;  %v593_v23 = vld [vmem:[#allocation2] sm:$0xf] }
 0x166   : > { %1338 = vmatpush3.bf16.msra.mxu0 %v1478_v22  ;;  %1359 = vmatprep.subr.bf16.mxu1 %v1590_v19 }
 0x167   : > { %1351 = vmatprep.subr.bf16.mxu0 %v1590_v19 }
 0x168   : > { %1348 = vmatmul.mubr.msk.bf16.vlgmr.msra.gmra.mxu1 %vm610_vm3, %v593_v23 }
 0x169   : > { %1340 = vmatmul.mubr.msk.bf16.vlgmr.msra.gmra.mxu0 %vm610_vm3, %v593_v23  ;;  %1361 = vmatprep.mubr.msk.bf16.mxu1 %vm1591_vm2, %v1590_v19 }
 0x16a   : > { %1355 = vmatprep.mubr.msk.bf16.mxu0 %vm1591_vm2, %v1590_v19  ;;  %1352 = vmatpush3.bf16.msra.mxu0 %v1479_v24 }
 0x16b   : > { %1353 = vmatprep.subr.bf16.mxu0 %v1590_v19 }
 0x16e   : > { %1354 = vmatpush3.bf16.msra.mxu0 %v1480_v25 }
 0x16f   : > { %1365 = vmatprep.subr.bf16.mxu0 %v1590_v19 }
 0x171   : > { %1356 = vmatmul.mubr.msk.bf16.vlgmr.msra.gmra.mxu0 %vm610_vm3, %v593_v23 }
 0x172   : > { %1367 = vmatprep.mubr.msk.bf16.mxu0 %vm1591_vm2, %v1590_v19 }
 0x228   : > { %v705_v26 = vpop.f32.mrf.mxu1 }
 0x229   : > { %v768_v27 = vpack.c.bf16 %v705_v26, %v705_v26  ;;  %v648_v28 = vpop.f32.mrf.mxu0 }
 0x22a   : > { %v1349_v29 = vpop.f32.mrf.mxu1  ;;  %v654_v31 = vmul.f32 0.17677669, %v648_v28 }
 0x22b   : > { %v774_v30 = vsel %vm769_vm4, %v768_v27, 0  ;;  %v1341_v32 = vpop.f32.mrf.mxu0 }
 0x22c   : > { %v708_v33 = vpop.f32.mrf.mxu1  ;;  %1360 = vmatpush3.bf16.xpose.msra.mxu1 %v774_v30  ;;  %v767_v36 = vpack.c.bf16 %v654_v31, %v654_v31 }
 0x22d   : > { %v651_v34 = vpop.f32.mrf.mxu0  ;;  %1371 = vmatprep.subr.bf16.mxu1 %v1590_v19 }
 0x22e   : > { %v1350_v35 = vpop.f32.mrf.mxu1 }
 0x22f   : > { %v1342_v37 = vpop.f32.mrf.mxu0 }
 0x231   : > { %v761_v43 = vpop.f32.mrf.mxu0 }
 0x232   : > { %v826_v44 = vpack.c.bf16 %v761_v43, %v761_v43 }
 0x233   : > { %1362 = vmatmul.mubr.msk.bf16.vlgmr.msra.gmra.mxu1 %vm769_vm4, %v767_v36  ;;  %v1357_v45 = vpop.f32.mrf.mxu0 }
 0x234   : > { %1373 = vmatprep.mubr.msk.bf16.mxu1 %vm1591_vm2, %v1590_v19  ;;  %v832_v46 = vsel %vm830_vm5, %v826_v44, 0  ;;  %1372 = vmatpush3.bf16.msra.mxu1 %v883_v56 }
 0x235   : > { %v764_v47 = vpop.f32.mrf.mxu0  ;;  %1366 = vmatpush3.bf16.msra.mxu0 %v832_v46 }
 0x237   : > { %v1358_v48 = vpop.f32.mrf.mxu0 }
 0x2f3   : > { %v810_v38 = vpop.f32.mrf.mxu1 }
 0x2f4   : > { %v816_v39 = vsel %vm769_vm4, %v810_v38, -inf }
 0x2f5   : > { %817 = vmax.xlane.f32.xlu0 %v816_v39  ;;  %v1363_v40 = vpop.f32.mrf.mxu1 }
 0x2f7   : > { %v813_v41 = vpop.f32.mrf.mxu1 }
 0x2f9   : > { %v1364_v42 = vpop.f32.mrf.mxu1 }
 0x37e   : > { %v818_v49 = vpop.xlane.xlu0 %817 }
 0x37f   : > { %v819_v50 = vsub.f32 %v810_v38, %v818_v49 }
 0x381   : > { %v820_v51 = vmul.f32 1.442695, %v819_v50 }
 0x383   : > { %1481 = vpow2.f32 %v820_v51 }
 0x390   : > { %v1482_v52 = vpop.eup %1481 }
 0x391   : > { %v822_v53 = vsel %vm769_vm4, %v1482_v52, 0.0  ;;  %v825_v54 = vpack.c.bf16 %v1482_v52, %v1482_v52 }
 0x392   : > { %823 = vadd.xlane.f32.xlu0 %v822_v53 }
 0x393   : > { %1368 = vmatmul.mubr.msk.bf16.vlgmr.msra.gmra.mxu0 %vm769_vm4, %v825_v54 }
 0x41b   : > { %v824_v57 = vpop.xlane.xlu0 %823 }
 0x41c   : > { %1483 = vrcp.f32 %v824_v57 }
 0x429   : > { %v1484_v58 = vpop.eup %1483 }
 0x453   : > { %v868_v59 = vpop.f32.mrf.mxu0 }
 0x454   : > { %v875_v60 = vmul.f32 %v1484_v58, %v868_v59 }
 0x455   : > { %v1369_v61 = vpop.f32.mrf.mxu0 }
 0x456   : > { %v877_v62 = vpack.c.bf16 %v875_v60, %v875_v60 }
 0x457   : > { %v871_v63 = vpop.f32.mrf.mxu0 }
 0x458   : > { %1374 = vmatmul.mubr.msk.bf16.vlgmr.msra.gmra.mxu1 %vm769_vm4, %v877_v62 }
 0x459   : > { %v1370_v0 = vpop.f32.mrf.mxu0 }
 0x518   : > { %v919_v2 = vpop.f32.mrf.mxu1 }
 0x519   : > { %v925_v3 = vadd.f32 %v919_v2, %v876_v1 }
 0x51a   : > { %v1375_v4 = vpop.f32.mrf.mxu1  ;;  %930 = sbr.rel (%p1291_p1) target bundleno = 2045 (0x7fd), region = 84 }
 0x51b   : > { %926 = vst.msk [vmem:[#allocation3] sm:$0xff] %vm610_vm3, %v925_v3 }
 0x51c   : > { %v922_v5 = vpop.f32.mrf.mxu1 }
 0x51e   : > { %v1376_v6 = vpop.f32.mrf.mxu1 }
 0x51f   : > { %v931_v7 = vld [vmem:[%s1751_s21] sm:$0xff]  ;;  %v1485_v18 = vld [vmem:[%s1906_s10 + $0x8] sm:$0xff]   ;;  %v1592_v19 = vmov 0.0   ;;  %vm1593_vm6 = vmmov 0   ;;  %v1487_v31 = vld [vmem:[%s1908_s12 + $0x18] sm:$0xff]   ;;  %vm1084_vm7 = vcmask 523264  }
 0x520   : > { %v1292_v9 = vld [vmem:[%s1903_s7] ss:$0 sm:$0xff]  ;;  %1377 = vmatprep.subr.bf16.mxu0 %v1592_v19  ;;  %1381 = vmatprep.mubr.msk.bf16.mxu0 %vm1593_vm6, %v1592_v19  ;;  %v1488_v32 = vld [vmem:[%s1908_s12 + $0x10] sm:$0xff]   ;;  %v1489_v33 = vld [vmem:[%s1908_s12 + $0x8] sm:$0xff]  }
 0x521   : > { %1378 = vmatpush3.bf16.msra.mxu0 %v1485_v18  ;;  %v1486_v20 = vld [vmem:[%s1906_s10] sm:$0xff]   ;;  %1385 = vmatprep.subr.bf16.mxu1 %v1592_v19 }
 0x522   : > { %v932_v8 = vld [vmem:[#allocation3] sm:$0xff]  ;;  %1379 = vmatprep.subr.bf16.mxu0 %v1592_v19  ;;  %1393 = vmatprep.mubr.msk.bf16.mxu1 %vm1593_vm6, %v1592_v19  ;;  %v1293_v25 = vld [vmem:[%s1904_s8] ss:$0 sm:$0xff] }
 0x523   : > { %v933_v10 = vadd.f32 %v932_v8, %v931_v7  ;;  %v1294_v27 = vld [vmem:[%s1905_s9] ss:$0 sm:$0xff]  ;;  %1386 = vmatpush3.bf16.msra.mxu1 %v1487_v31 }
 0x524   : > { %1387 = vmatprep.subr.bf16.mxu1 %v1592_v19  ;;  %v1490_v34 = vld [vmem:[%s1908_s12] sm:$0xff]  }
 0x525   : > { %v941_v11 = vadd.f32 %v1292_v9, %v933_v10  ;;  %1380 = vmatpush3.bf16.msra.mxu0 %v1486_v20  ;;  %v1295_v35 = vld [vmem:[%s1907_s11] ss:$0 sm:$0xff] }
 0x526   : > { %v1299_v47 = vld [vmem:[%s1943_s25] ss:$0 sm:$0xff] }
 0x527   : > { %v944_v12 = vsel %vm610_vm3, %v941_v11, 0.0  ;;  %1388 = vmatpush3.bf16.msra.mxu1 %v1488_v32 }
 0x528   : > { %945 = vadd.xlane.f32.xlu0 %v944_v12  ;;  %1389 = vmatprep.subr.bf16.mxu1 %v1592_v19 }
 0x52b   : > { %1390 = vmatpush3.bf16.msra.mxu1 %v1489_v33 }
 0x52c   : > { %1391 = vmatprep.subr.bf16.mxu1 %v1592_v19 }
 0x52f   : > { %1392 = vmatpush3.bf16.msra.mxu1 %v1490_v34 }
 0x5b1   : > { %v946_v13 = vpop.xlane.xlu0 %945 }
 0x5b2   : > { %v948_v14 = vmul.f32 0.03125, %v946_v13 }
 0x5b4   : > { %v949_v15 = vsub.f32 %v941_v11, %v948_v14 }
 0x5b6   : > { %v950_v16 = vmul.f32 %v949_v15, %v949_v15 }
 0x5b8   : > { %v951_v17 = vsel %vm610_vm3, %v950_v16, 0.0 }
 0x5b9   : > { %952 = vadd.xlane.f32.xlu0 %v951_v17 }
 0x642   : > { %v953_v21 = vpop.xlane.xlu0 %952 }
 0x643   : > { %v954_v22 = vmul.f32 0.03125, %v953_v21 }
 0x645   : > { %v955_v23 = vadd.f32 1e-05, %v954_v22 }
 0x647   : > { %1491 = vrsqrt.f32 %v955_v23 }
 0x654   : > { %v1492_v24 = vpop.eup %1491 }
 0x655   : > { %v957_v26 = vmul.f32 %v1492_v24, %v949_v15 }
 0x657   : > { %v964_v28 = vmul.f32 %v1293_v25, %v957_v26 }
 0x659   : > { %v971_v29 = vadd.f32 %v1294_v27, %v964_v28 }
 0x65b   : > { %v972_v30 = vpack.c.bf16 %v971_v29, %v971_v29 }
 0x65d   : > { %1382 = vmatmul.mubr.msk.bf16.vlgmr.msra.gmra.mxu0 %vm610_vm3, %v972_v30 }
 0x71d   : > { %v1033_v36 = vpop.f32.mrf.mxu0 }
 0x71e   : > { %v1034_v37 = vadd.f32 %v1295_v35, %v1033_v36 }
 0x71f   : > { %v1383_v38 = vpop.f32.mrf.mxu0 }
 0x720   : > { %v1040_v39 = vmul.f32 0.70710677, %v1034_v37  ;;  %v1039_v43 = vmul.f32 0.5, %v1034_v37 }
 0x721   : > { %v1036_v40 = vpop.f32.mrf.mxu0 }
 0x722   : > { %1493 = verf.f32 %v1040_v39 }
 0x723   : > { %v1384_v41 = vpop.f32.mrf.mxu0 }
 0x72f   : > { %v1494_v42 = vpop.eup %1493 }
 0x730   : > { %v1042_v44 = vadd.f32 1.0, %v1494_v42 }
 0x732   : > { %v1043_v45 = vmul.f32 %v1042_v44, %v1039_v43 }
 0x734   : > { %v1044_v46 = vpack.c.bf16 %v1043_v45, %v1043_v45 }
 0x736   : > { %1394 = vmatmul.mubr.msk.bf16.vlgmr.msra.gmra.mxu1 %vm1084_vm7, %v1044_v46 }
 0x7f6   : > { %v1122_v48 = vpop.f32.mrf.mxu1 }
 0x7f7   : > { %v1123_v49 = vadd.f32 %v1299_v47, %v1122_v48 }
 0x7f8   : > { %v1395_v50 = vpop.f32.mrf.mxu1 }
 0x7f9   : > { %v1128_v51 = vadd.f32 %v1123_v49, %v941_v11 }
 0x7fa   : > { %v1125_v52 = vpop.f32.mrf.mxu1 }
 0x7fb   : > { %1129 = vst.msk [vmem:[%s528_s0] sm:$0xff] %vm610_vm3, %v1128_v51 }
 0x7fc   : > { %v1396_v53 = vpop.f32.mrf.mxu1 }
 0x7fd PF: > { %s1944_s26 = sld [smem:[#allocation10_spill]]  ;;  %s1144_s14 = sshll.u32 %s528_s0, 4  ;;  %s1145_s14 = int_to_ptr.vmem [resolvable:$true] %s1144_s14 }
 0x7fe   : > { %s1945_s21 = sld [smem:[#allocation8_spill]]  ;;  %s1495_s15 = scalar_lea.vmem %s1145_s14, 128 }
 0x7ff   : > { %s1947_s28 = sld [smem:[#allocation21_spill]]  ;;  %p1496_p2 = scmp.ne.s32.totalorder %s1145_s14, %s1495_s15 }
 0x800   : > { %s1594_s17 = smov [#allocation4]  }
 0x801   : > { %p1497_p4 = pnand %p1496_p2, %p1719_p3  ;;  %s1499_s16 = sshll.u32 %s1594_s17, 4  ;;  %s1500_s16 = int_to_ptr.vmem [resolvable:$false] %s1499_s16 }
 0x802   : > { %s1501_s20 = scalar_lea.vmem %s1500_s16, 256  ;;  %p1502_p6 = scmp.lt.s32.totalorder %s1145_s14, %s1500_s16 }
 0x803   : > { %s1306_s18 = sshll.u32 %s1944_s26, 7  ;;  %p1498_p5 = pneg %p1497_p4 }
 0x804   : > { %s1948_s29 = sand.u32 1, %s1945_s21   ;;  %p1503_p7 = scmp.lt.s32.totalorder %s1501_s20, %s1495_s15 }
 0x805   : > { %s1142_s13 = scalar_lea.hbm %s1947_s28, %s1306_s18  ;;  %s1131_s30 = scalar_lea.sflag [#allocation5], %s1948_s29 }
 0x806   : > { %p1504_p8 = por %p1503_p7, %p1502_p6 }
 0x808   : > { %p1505_p10 = pnand %p1504_p8, %p1498_p5 }
 0x80a   : > { %1508 = shalt.err (!%p1505_p10)
}
 0x80b   : > { %s1509_s24 = scalar_lea.hbm %s1142_s13, 128  ;;  %s1513_s25 = scalar_lea.hbm %s1947_s28, 256 }
 0x80c   : > { %p1510_p11 = scmp.ne.s32.totalorder %s1142_s13, %s1509_s24  ;;  %p1514_p0 = scmp.lt.s32.totalorder %s1142_s13, %s1947_s28 }
 0x80d   : > { %p1515_p1 = scmp.lt.s32.totalorder %s1513_s25, %s1509_s24 }
 0x80e   : > { %p1511_p12 = pnand %p1510_p11, %p1719_p3 }
 0x80f   : > { %p1516_p2 = por %p1515_p1, %p1514_p0 }
 0x810   : > { %p1512_p13 = pneg %p1511_p12 }
 0x812   : > { %p1517_p4 = pnand %p1516_p2, %p1512_p13 }
 0x814   : > { %1520 = shalt.err (!%p1517_p4)
}
 0x815   : > { %1397 = dma.vmem_to_hbm [thread:$0]  (%p1719_p3), %s1145_s14, 128, %s1142_s13, %s1131_s30  }
 0x816 PF: > { %s1949_s18 = sld [smem:[#allocation13_spill]] }
 0x817   : > { %s1950_s27 = sld [smem:[#allocation7_spill]] }
 0x81c   : > { %p1403_p5 = scmp.ge.s32.totalorder %s1949_s18, 2 }
 0x81d   : > { %s1156_s29 = sand.u32 1, %s1950_s27  }
 0x81e   : > { %p1400_p6 = pnand %p1403_p5, %p1729_p9  ;;  %s1157_s15 = scalar_lea.sflag [#allocation5], %s1156_s29 }
 0x820   : > { %p1401_p7 = pneg %p1400_p6 }
 0x822   : > { %1554 = dma.done.wait (%p1401_p7), %s1157_s15, 128  }
 0x823   : > { %1556 = vsyncadd (%p1401_p7), %s1157_s15, 4294967168  ;;  %s27_s20 = sadd.s32 1, %s1949_s18   ;;  %s1952_s29 = sld [smem:[#allocation8_spill]] }
 0x824   : > { %p24_p8 = scmp.ge.s32.totalorder %s27_s20, 10   ;;  %s1953_s30 = sld [smem:[#allocation9_spill]] }
 0x825   : > { %s1954_s15 = sld [smem:[#allocation18_spill]] }
 0x826   : > { %s1955_s16 = sld [smem:[#allocation11_spill]]  ;;  %26 = sbr.rel (!%p24_p8) target bundleno = 9 (0x9), region = 131 }
 0x827   : > { %s1956_s17 = sld [smem:[#allocation12_spill]] }
 0x828   : > { %s1957_s18 = sld [smem:[#allocation14_spill]] }
 0x829   : > { %s1958_s19 = sld [smem:[#allocation16_spill]] }
 0x82b   :  { %1162 = vsyncpa [#allocation5], 1 }
 0x82c   :  { %1164 = vsyncpa [#allocation5 + $0x1], 1 }

</bundles_post_ra>
